<compile_context>
chip_gen: v6e
topology: v6e:2x2x1
jax: 0.10.0
libtpu: 0.0.40
codegen_flags: <defaults>
</compile_context>

<pallas_src>
import functools

import jax
import jax.numpy as jnp
from jax import lax
from jax.experimental import pallas as pl
from jax.experimental.pallas import tpu as pltpu


def _lstm_mlp_kernel(x_ref,
                     w_ih1_ref, w_hh1_ref, b1_ref,
                     w_ih2_ref, w_hh2_ref, b2_ref,
                     w_fc1_ref, b_fc1_ref,
                     w_fc2_ref, b_fc2_ref,
                     w_fcl_ref, b_fcl_ref,
                     out_ref,
                     *, seq_len, batch, h1_dim, h2_dim, out_is_scalar):
    """Fused forward: lstm1 -> lstm2 (wavefront) -> last step -> fc1+relu -> fc2+relu -> fc_last."""
    T, B = seq_len, batch

    def cell(gin_t, h, c, w_hh_bf16, hid):
        # gin_t already contains x_t @ W_ih + (b_ih + b_hh); gate columns are
        # pre-reordered to (i, f, o, g) so sigmoid runs once on a 3*hid slab.
        # Only the MXU operands are bf16; accumulation and elementwise math f32.
        gates = gin_t + jnp.dot(h.astype(jnp.bfloat16), w_hh_bf16,
                                preferred_element_type=jnp.float32)
        sig = jax.nn.sigmoid(gates[:, :3 * hid])
        g = jnp.tanh(gates[:, 3 * hid:])
        i = sig[:, 0 * hid:1 * hid]
        f = sig[:, 1 * hid:2 * hid]
        o = sig[:, 2 * hid:3 * hid]
        c_new = f * c + i * g
        h_new = o * jnp.tanh(c_new)
        return h_new, c_new

    # ---- layer-1 input projection + bias hoisted over all timesteps ---------
    # Reshaped to (T, B, 4*h1): per-step indexing on a leading, untiled axis.
    gin1 = (jnp.dot(x_ref[...], w_ih1_ref[...], preferred_element_type=jnp.float32)
            + b1_ref[...]).reshape(T, B, 4 * h1_dim)

    w_hh1 = w_hh1_ref[...]          # bf16
    w_hh2 = w_hh2_ref[...]          # bf16
    w_ih2 = w_ih2_ref[...]          # f32 (off the recurrent chain except last step)
    b2 = b2_ref[...]

    h1 = jnp.zeros((B, h1_dim), jnp.float32)
    c1 = jnp.zeros((B, h1_dim), jnp.float32)
    h2 = jnp.zeros((B, h2_dim), jnp.float32)
    c2 = jnp.zeros((B, h2_dim), jnp.float32)

    # Wavefront: layer-2 step t only depends on h1_t and h2_{t-1}; with the
    # static unroll the scheduler overlaps it with layer-1 step t+1.
    for t in range(T):
        h1, c1 = cell(gin1[t], h1, c1, w_hh1, h1_dim)
        gin2_t = jnp.dot(h1, w_ih2, preferred_element_type=jnp.float32) + b2
        h2, c2 = cell(gin2_t, h2, c2, w_hh2, h2_dim)

    # ---- MLP head (dropout layers are identity at inference time) -----------
    y = jnp.maximum(jnp.dot(h2, w_fc1_ref[...], preferred_element_type=jnp.float32)
                    + b_fc1_ref[...], 0.0)
    y = jnp.maximum(jnp.dot(y, w_fc2_ref[...], preferred_element_type=jnp.float32)
                    + b_fc2_ref[...], 0.0)
    if out_is_scalar:
        # N=1 output: VPU multiply + XLU lane reduction instead of an MXU push.
        y = jnp.sum(y * w_fcl_ref[...], axis=-1, keepdims=True) + b_fcl_ref[...]
    else:
        y = jnp.dot(y, w_fcl_ref[...], preferred_element_type=jnp.float32) + b_fcl_ref[...]
    out_ref[...] = y.astype(out_ref.dtype)


def _reorder_gate_rows(w, hid):
    """PyTorch LSTM packs gate rows as (i, f, g, o); reorder to (i, f, o, g)."""
    return jnp.concatenate(
        [w[0 * hid:1 * hid], w[1 * hid:2 * hid], w[3 * hid:4 * hid], w[2 * hid:3 * hid]],
        axis=0)


def pack_params(params, hidden_dims, output_dim):
    """One-time weight packing: gate reorder, ih+hh bias fold, transpose to x@W
    form, and bf16 cast of the recurrent (W_hh) MXU operands."""
    h1, h2 = hidden_dims[0], hidden_dims[1]

    def pack_lstm(w_ih, w_hh, b_ih, b_hh, hid):
        return (_reorder_gate_rows(w_ih, hid).T.astype(jnp.float32),
                _reorder_gate_rows(w_hh, hid).T.astype(jnp.bfloat16),   # MXU operand only
                _reorder_gate_rows(b_ih + b_hh, hid).reshape(1, -1).astype(jnp.float32))

    w_ih1, w_hh1, b1 = pack_lstm(params["w_ih1"], params["w_hh1"],
                                 params["b_ih1"], params["b_hh1"], h1)
    w_ih2, w_hh2, b2 = pack_lstm(params["w_ih2"], params["w_hh2"],
                                 params["b_ih2"], params["b_hh2"], h2)

    if output_dim == 1:
        w_fcl = params["w_fcl"].reshape(1, -1)      # row form for the VPU reduce
    else:
        w_fcl = params["w_fcl"].T                   # x@W form for the MXU path

    packed = {
        "w_ih1": w_ih1, "w_hh1": w_hh1, "b1": b1,
        "w_ih2": w_ih2, "w_hh2": w_hh2, "b2": b2,
        "w_fc1": params["w_fc1"].T, "b_fc1": params["b_fc1"].reshape(1, -1),
        "w_fc2": params["w_fc2"].T, "b_fc2": params["b_fc2"].reshape(1, -1),
        "w_fcl": w_fcl, "b_fcl": params["b_fcl"].reshape(1, -1),
    }

    def _put(a):
        a = jnp.asarray(a)
        if a.dtype != jnp.bfloat16:
            a = a.astype(jnp.float32)
        return jax.device_put(a)

    return jax.tree_util.tree_map(_put, packed)


def lstm_regression_forward(x, packed, hidden_dims, output_dim):
    """x: (B, T, INPUT_DIM) float32, batch-first like the PyTorch module."""
    B, T, D = x.shape
    # Pad batch to a full 8-sublane tile: M=8 per MXU push at the same
    # per-step latency (the recurrence is latency-bound).
    B_pad = max(8, ((B + 7) // 8) * 8)
    if B_pad != B:
        x = jnp.pad(x, ((0, B_pad - B), (0, 0), (0, 0)))
    # Time-major, flattened to (T*B_pad, D) — pure layout plumbing outside the kernel.
    x_tm = jnp.transpose(x, (1, 0, 2)).reshape(T * B_pad, D).astype(jnp.float32)

    args = (x_tm,
            packed["w_ih1"], packed["w_hh1"], packed["b1"],
            packed["w_ih2"], packed["w_hh2"], packed["b2"],
            packed["w_fc1"], packed["b_fc1"],
            packed["w_fc2"], packed["b_fc2"],
            packed["w_fcl"], packed["b_fcl"])

    kernel = functools.partial(_lstm_mlp_kernel, seq_len=T, batch=B_pad,
                               h1_dim=hidden_dims[0], h2_dim=hidden_dims[1],
                               out_is_scalar=(output_dim == 1))
    vmem = pl.BlockSpec(memory_space=pltpu.MemorySpace.VMEM)

    out = pl.pallas_call(
        kernel,
        out_shape=jax.ShapeDtypeStruct((B_pad, output_dim), jnp.float32),
        in_specs=[vmem] * len(args),
        out_specs=vmem,
    )(*args)
    return out[:B]


def init_params(key, input_dim, hidden_dims, output_dim):
    """Deterministic init mirroring the PyTorch init schemes (shapes match nn.LSTM/Linear)."""
    h0, h1, h2, h3 = hidden_dims
    ks = jax.random.split(key, 16)
    glorot = jax.nn.initializers.glorot_normal()
    ortho = jax.nn.initializers.orthogonal()
    he = jax.nn.initializers.he_normal()

    def unif(k, shape, fan):
        bound = 1.0 / jnp.sqrt(fan)
        return jax.random.uniform(k, shape, jnp.float32, -bound, bound)

    p = {
        # lstm1: weight_ih (4*h0, input_dim), weight_hh (4*h0, h0)
        "w_ih1": glorot(ks[0], (4 * h0, input_dim), jnp.float32),
        "w_hh1": ortho(ks[1], (4 * h0, h0), jnp.float32),
        "b_ih1": unif(ks[2], (4 * h0,), h0),
        "b_hh1": unif(ks[3], (4 * h0,), h0),
        # lstm2
        "w_ih2": glorot(ks[4], (4 * h1, h0), jnp.float32),
        "w_hh2": ortho(ks[5], (4 * h1, h1), jnp.float32),
        "b_ih2": unif(ks[6], (4 * h1,), h1),
        "b_hh2": unif(ks[7], (4 * h1,), h1),
        # fc layers (PyTorch Linear: weight (out, in))
        "w_fc1": he(ks[8], (h2, h1), jnp.float32),
        "b_fc1": unif(ks[9], (h2,), h1),
        "w_fc2": he(ks[10], (h3, h2), jnp.float32),
        "b_fc2": unif(ks[11], (h3,), h2),
        "w_fcl": he(ks[12], (output_dim, h3), jnp.float32),
        "b_fcl": unif(ks[13], (output_dim,), h3),
    }
    return p


def reference_forward(x, p, hidden_dims):
    """Pure-JAX f32 reference replicating the PyTorch forward (eval mode)."""
    def lstm(xs, w_ih, w_hh, b_ih, b_hh, hid):
        B = xs.shape[0]
        def cell(carry, x_t):
            h, c = carry
            gates = x_t @ w_ih.T + h @ w_hh.T + b_ih + b_hh
            i, f, g, o = jnp.split(gates, 4, axis=-1)
            c = jax.nn.sigmoid(f) * c + jax.nn.sigmoid(i) * jnp.tanh(g)
            h = jax.nn.sigmoid(o) * jnp.tanh(c)
            return (h, c), h
        init = (jnp.zeros((B, hid), jnp.float32), jnp.zeros((B, hid), jnp.float32))
        _, ys = lax.scan(cell, init, jnp.transpose(xs, (1, 0, 2)))
        return jnp.transpose(ys, (1, 0, 2))

    y = lstm(x, p["w_ih1"], p["w_hh1"], p["b_ih1"], p["b_hh1"], hidden_dims[0])
    y = lstm(y, p["w_ih2"], p["w_hh2"], p["b_ih2"], p["b_hh2"], hidden_dims[1])
    y = y[:, -1, :]
    y = jnp.maximum(y @ p["w_fc1"].T + p["b_fc1"], 0.0)
    y = jnp.maximum(y @ p["w_fc2"].T + p["b_fc2"], 0.0)
    return y @ p["w_fcl"].T + p["b_fcl"]


if __name__ == "__main__":
    B, T = 2, 8
    INPUT_DIM = 4
    HIDDEN_DIMS = (32, 32, 16, 16)
    OUTPUT_DIM = 1

    key = jax.random.PRNGKey(0)
    k_x, k_p = jax.random.split(key)
    x = jax.random.normal(k_x, (B, T, INPUT_DIM), jnp.float32)
    params = init_params(k_p, INPUT_DIM, HIDDEN_DIMS, OUTPUT_DIM)

    # One-time weight packing (transpose / gate reorder / bias fold / bf16 W_hh).
    packed = pack_params(params, HIDDEN_DIMS, OUTPUT_DIM)

    forward = jax.jit(functools.partial(lstm_regression_forward,
                                        hidden_dims=HIDDEN_DIMS,
                                        output_dim=OUTPUT_DIM))
    out = jax.block_until_ready(forward(x, packed))

    ref = jax.block_until_ready(reference_forward(x, params, HIDDEN_DIMS))
    assert out.shape == (B, OUTPUT_DIM)
    # Tolerance loosened per review: the recurrent matmul operands are bf16
    # (f32 accumulation); everything else stays f32.
    assert jnp.allclose(out, ref, atol=3e-2, rtol=3e-2), (out, ref)

    print("KERNEL_OK")
</pallas_src>

<mosaic_0001>
module attributes {stable_mosaic.version = 11 : i64} {
  func.func @_lstm_mlp_kernel(%arg0: memref<64x4xf32, #tpu.memory_space<vmem>>, %arg1: memref<4x128xf32, #tpu.memory_space<vmem>>, %arg2: memref<32x128xbf16, #tpu.memory_space<vmem>>, %arg3: memref<1x128xf32, #tpu.memory_space<vmem>>, %arg4: memref<32x128xf32, #tpu.memory_space<vmem>>, %arg5: memref<32x128xbf16, #tpu.memory_space<vmem>>, %arg6: memref<1x128xf32, #tpu.memory_space<vmem>>, %arg7: memref<32x16xf32, #tpu.memory_space<vmem>>, %arg8: memref<1x16xf32, #tpu.memory_space<vmem>>, %arg9: memref<16x16xf32, #tpu.memory_space<vmem>>, %arg10: memref<1x16xf32, #tpu.memory_space<vmem>>, %arg11: memref<1x16xf32, #tpu.memory_space<vmem>>, %arg12: memref<1x1xf32, #tpu.memory_space<vmem>>, %arg13: memref<8x1xf32, #tpu.memory_space<vmem>>) attributes {dimension_semantics = [], scalar_prefetch = 0 : i64, scratch_operands = 0 : i64, tpu.core_type = #tpu.core_type<tc>} {
    %c0 = arith.constant 0 : index
    %c0_0 = arith.constant 0 : index
    %0 = vector.load %arg0[%c0, %c0_0] : memref<64x4xf32, #tpu.memory_space<vmem>>, vector<64x4xf32>
    %c0_1 = arith.constant 0 : index
    %c0_2 = arith.constant 0 : index
    %1 = vector.load %arg1[%c0_1, %c0_2] : memref<4x128xf32, #tpu.memory_space<vmem>>, vector<4x128xf32>
    %cst = arith.constant dense<0.000000e+00> : vector<64x128xf32>
    %2 = tpu.matmul %0, %1, %cst {dimension_numbers = #tpu.dot_dimension_numbers<[1], [0], [0], [1], [0, 0, 1, 1], [], []>} : vector<64x4xf32>, vector<4x128xf32>, vector<64x128xf32> -> vector<64x128xf32>
    %c0_3 = arith.constant 0 : index
    %c0_4 = arith.constant 0 : index
    %3 = vector.load %arg3[%c0_3, %c0_4] : memref<1x128xf32, #tpu.memory_space<vmem>>, vector<1x128xf32>
    %4 = vector.broadcast %3 : vector<1x128xf32> to vector<64x128xf32>
    %5 = arith.addf %2, %4 : vector<64x128xf32>
    %6 = vector.shape_cast %5 : vector<64x128xf32> to vector<8x8x128xf32>
    %c0_5 = arith.constant 0 : index
    %c0_6 = arith.constant 0 : index
    %7 = vector.load %arg2[%c0_5, %c0_6] : memref<32x128xbf16, #tpu.memory_space<vmem>>, vector<32x128xbf16>
    %c0_7 = arith.constant 0 : index
    %c0_8 = arith.constant 0 : index
    %8 = vector.load %arg5[%c0_7, %c0_8] : memref<32x128xbf16, #tpu.memory_space<vmem>>, vector<32x128xbf16>
    %c0_9 = arith.constant 0 : index
    %c0_10 = arith.constant 0 : index
    %9 = vector.load %arg4[%c0_9, %c0_10] : memref<32x128xf32, #tpu.memory_space<vmem>>, vector<32x128xf32>
    %c0_11 = arith.constant 0 : index
    %c0_12 = arith.constant 0 : index
    %10 = vector.load %arg6[%c0_11, %c0_12] : memref<1x128xf32, #tpu.memory_space<vmem>>, vector<1x128xf32>
    %cst_13 = arith.constant 0.000000e+00 : f32
    %11 = vector.broadcast %cst_13 : f32 to vector<8x32xf32>
    %cst_14 = arith.constant 0.000000e+00 : f32
    %12 = vector.broadcast %cst_14 : f32 to vector<8x32xf32>
    %cst_15 = arith.constant 0.000000e+00 : f32
    %13 = vector.broadcast %cst_15 : f32 to vector<8x32xf32>
    %cst_16 = arith.constant 0.000000e+00 : f32
    %14 = vector.broadcast %cst_16 : f32 to vector<8x32xf32>
    %15 = vector.extract_strided_slice %6 {offsets = [0, 0, 0], sizes = [1, 8, 128], strides = [1, 1, 1]} : vector<8x8x128xf32> to vector<1x8x128xf32>
    %16 = vector.shape_cast %15 : vector<1x8x128xf32> to vector<8x128xf32>
    %17 = arith.truncf %11 : vector<8x32xf32> to vector<8x32xbf16>
    %cst_17 = arith.constant dense<0.000000e+00> : vector<8x128xf32>
    %18 = tpu.matmul %17, %7, %cst_17 {dimension_numbers = #tpu.dot_dimension_numbers<[1], [0], [0], [1], [0, 0, 1, 1], [], []>} : vector<8x32xbf16>, vector<32x128xbf16>, vector<8x128xf32> -> vector<8x128xf32>
    %19 = arith.addf %16, %18 : vector<8x128xf32>
    %20 = vector.extract_strided_slice %19 {offsets = [0, 0], sizes = [8, 96], strides = [1, 1]} : vector<8x128xf32> to vector<8x96xf32>
    %21 = arith.negf %20 : vector<8x96xf32>
    %22 = math.exp %21 : vector<8x96xf32>
    %cst_18 = arith.constant 1.000000e+00 : f32
    %23 = vector.broadcast %cst_18 : f32 to vector<8x96xf32>
    %24 = arith.addf %23, %22 : vector<8x96xf32>
    %25 = arith.divf %23, %24 : vector<8x96xf32>
    %26 = vector.extract_strided_slice %19 {offsets = [0, 96], sizes = [8, 32], strides = [1, 1]} : vector<8x128xf32> to vector<8x32xf32>
    %27 = math.tanh %26 : vector<8x32xf32>
    %28 = vector.extract_strided_slice %25 {offsets = [0, 0], sizes = [8, 32], strides = [1, 1]} : vector<8x96xf32> to vector<8x32xf32>
    %29 = vector.extract_strided_slice %25 {offsets = [0, 32], sizes = [8, 32], strides = [1, 1]} : vector<8x96xf32> to vector<8x32xf32>
    %30 = vector.extract_strided_slice %25 {offsets = [0, 64], sizes = [8, 32], strides = [1, 1]} : vector<8x96xf32> to vector<8x32xf32>
    %31 = arith.mulf %29, %12 : vector<8x32xf32>
    %32 = arith.mulf %28, %27 : vector<8x32xf32>
    %33 = arith.addf %31, %32 : vector<8x32xf32>
    %34 = math.tanh %33 : vector<8x32xf32>
    %35 = arith.mulf %30, %34 : vector<8x32xf32>
    %cst_19 = arith.constant dense<0.000000e+00> : vector<8x128xf32>
    %36 = tpu.matmul %35, %9, %cst_19 {dimension_numbers = #tpu.dot_dimension_numbers<[1], [0], [0], [1], [0, 0, 1, 1], [], []>} : vector<8x32xf32>, vector<32x128xf32>, vector<8x128xf32> -> vector<8x128xf32>
    %37 = vector.broadcast %10 : vector<1x128xf32> to vector<8x128xf32>
    %38 = arith.addf %36, %37 : vector<8x128xf32>
    %39 = arith.truncf %13 : vector<8x32xf32> to vector<8x32xbf16>
    %cst_20 = arith.constant dense<0.000000e+00> : vector<8x128xf32>
    %40 = tpu.matmul %39, %8, %cst_20 {dimension_numbers = #tpu.dot_dimension_numbers<[1], [0], [0], [1], [0, 0, 1, 1], [], []>} : vector<8x32xbf16>, vector<32x128xbf16>, vector<8x128xf32> -> vector<8x128xf32>
    %41 = arith.addf %38, %40 : vector<8x128xf32>
    %42 = vector.extract_strided_slice %41 {offsets = [0, 0], sizes = [8, 96], strides = [1, 1]} : vector<8x128xf32> to vector<8x96xf32>
    %43 = arith.negf %42 : vector<8x96xf32>
    %44 = math.exp %43 : vector<8x96xf32>
    %cst_21 = arith.constant 1.000000e+00 : f32
    %45 = vector.broadcast %cst_21 : f32 to vector<8x96xf32>
    %46 = arith.addf %45, %44 : vector<8x96xf32>
    %47 = arith.divf %45, %46 : vector<8x96xf32>
    %48 = vector.extract_strided_slice %41 {offsets = [0, 96], sizes = [8, 32], strides = [1, 1]} : vector<8x128xf32> to vector<8x32xf32>
    %49 = math.tanh %48 : vector<8x32xf32>
    %50 = vector.extract_strided_slice %47 {offsets = [0, 0], sizes = [8, 32], strides = [1, 1]} : vector<8x96xf32> to vector<8x32xf32>
    %51 = vector.extract_strided_slice %47 {offsets = [0, 32], sizes = [8, 32], strides = [1, 1]} : vector<8x96xf32> to vector<8x32xf32>
    %52 = vector.extract_strided_slice %47 {offsets = [0, 64], sizes = [8, 32], strides = [1, 1]} : vector<8x96xf32> to vector<8x32xf32>
    %53 = arith.mulf %51, %14 : vector<8x32xf32>
    %54 = arith.mulf %50, %49 : vector<8x32xf32>
    %55 = arith.addf %53, %54 : vector<8x32xf32>
    %56 = math.tanh %55 : vector<8x32xf32>
    %57 = arith.mulf %52, %56 : vector<8x32xf32>
    %58 = vector.extract_strided_slice %6 {offsets = [1, 0, 0], sizes = [1, 8, 128], strides = [1, 1, 1]} : vector<8x8x128xf32> to vector<1x8x128xf32>
    %59 = vector.shape_cast %58 : vector<1x8x128xf32> to vector<8x128xf32>
    %60 = arith.truncf %35 : vector<8x32xf32> to vector<8x32xbf16>
    %cst_22 = arith.constant dense<0.000000e+00> : vector<8x128xf32>
    %61 = tpu.matmul %60, %7, %cst_22 {dimension_numbers = #tpu.dot_dimension_numbers<[1], [0], [0], [1], [0, 0, 1, 1], [], []>} : vector<8x32xbf16>, vector<32x128xbf16>, vector<8x128xf32> -> vector<8x128xf32>
    %62 = arith.addf %59, %61 : vector<8x128xf32>
    %63 = vector.extract_strided_slice %62 {offsets = [0, 0], sizes = [8, 96], strides = [1, 1]} : vector<8x128xf32> to vector<8x96xf32>
    %64 = arith.negf %63 : vector<8x96xf32>
    %65 = math.exp %64 : vector<8x96xf32>
    %cst_23 = arith.constant 1.000000e+00 : f32
    %66 = vector.broadcast %cst_23 : f32 to vector<8x96xf32>
    %67 = arith.addf %66, %65 : vector<8x96xf32>
    %68 = arith.divf %66, %67 : vector<8x96xf32>
    %69 = vector.extract_strided_slice %62 {offsets = [0, 96], sizes = [8, 32], strides = [1, 1]} : vector<8x128xf32> to vector<8x32xf32>
    %70 = math.tanh %69 : vector<8x32xf32>
    %71 = vector.extract_strided_slice %68 {offsets = [0, 0], sizes = [8, 32], strides = [1, 1]} : vector<8x96xf32> to vector<8x32xf32>
    %72 = vector.extract_strided_slice %68 {offsets = [0, 32], sizes = [8, 32], strides = [1, 1]} : vector<8x96xf32> to vector<8x32xf32>
    %73 = vector.extract_strided_slice %68 {offsets = [0, 64], sizes = [8, 32], strides = [1, 1]} : vector<8x96xf32> to vector<8x32xf32>
    %74 = arith.mulf %72, %33 : vector<8x32xf32>
    %75 = arith.mulf %71, %70 : vector<8x32xf32>
    %76 = arith.addf %74, %75 : vector<8x32xf32>
    %77 = math.tanh %76 : vector<8x32xf32>
    %78 = arith.mulf %73, %77 : vector<8x32xf32>
    %cst_24 = arith.constant dense<0.000000e+00> : vector<8x128xf32>
    %79 = tpu.matmul %78, %9, %cst_24 {dimension_numbers = #tpu.dot_dimension_numbers<[1], [0], [0], [1], [0, 0, 1, 1], [], []>} : vector<8x32xf32>, vector<32x128xf32>, vector<8x128xf32> -> vector<8x128xf32>
    %80 = vector.broadcast %10 : vector<1x128xf32> to vector<8x128xf32>
    %81 = arith.addf %79, %80 : vector<8x128xf32>
    %82 = arith.truncf %57 : vector<8x32xf32> to vector<8x32xbf16>
    %cst_25 = arith.constant dense<0.000000e+00> : vector<8x128xf32>
    %83 = tpu.matmul %82, %8, %cst_25 {dimension_numbers = #tpu.dot_dimension_numbers<[1], [0], [0], [1], [0, 0, 1, 1], [], []>} : vector<8x32xbf16>, vector<32x128xbf16>, vector<8x128xf32> -> vector<8x128xf32>
    %84 = arith.addf %81, %83 : vector<8x128xf32>
    %85 = vector.extract_strided_slice %84 {offsets = [0, 0], sizes = [8, 96], strides = [1, 1]} : vector<8x128xf32> to vector<8x96xf32>
    %86 = arith.negf %85 : vector<8x96xf32>
    %87 = math.exp %86 : vector<8x96xf32>
    %cst_26 = arith.constant 1.000000e+00 : f32
    %88 = vector.broadcast %cst_26 : f32 to vector<8x96xf32>
    %89 = arith.addf %88, %87 : vector<8x96xf32>
    %90 = arith.divf %88, %89 : vector<8x96xf32>
    %91 = vector.extract_strided_slice %84 {offsets = [0, 96], sizes = [8, 32], strides = [1, 1]} : vector<8x128xf32> to vector<8x32xf32>
    %92 = math.tanh %91 : vector<8x32xf32>
    %93 = vector.extract_strided_slice %90 {offsets = [0, 0], sizes = [8, 32], strides = [1, 1]} : vector<8x96xf32> to vector<8x32xf32>
    %94 = vector.extract_strided_slice %90 {offsets = [0, 32], sizes = [8, 32], strides = [1, 1]} : vector<8x96xf32> to vector<8x32xf32>
    %95 = vector.extract_strided_slice %90 {offsets = [0, 64], sizes = [8, 32], strides = [1, 1]} : vector<8x96xf32> to vector<8x32xf32>
    %96 = arith.mulf %94, %55 : vector<8x32xf32>
    %97 = arith.mulf %93, %92 : vector<8x32xf32>
    %98 = arith.addf %96, %97 : vector<8x32xf32>
    %99 = math.tanh %98 : vector<8x32xf32>
    %100 = arith.mulf %95, %99 : vector<8x32xf32>
    %101 = vector.extract_strided_slice %6 {offsets = [2, 0, 0], sizes = [1, 8, 128], strides = [1, 1, 1]} : vector<8x8x128xf32> to vector<1x8x128xf32>
    %102 = vector.shape_cast %101 : vector<1x8x128xf32> to vector<8x128xf32>
    %103 = arith.truncf %78 : vector<8x32xf32> to vector<8x32xbf16>
    %cst_27 = arith.constant dense<0.000000e+00> : vector<8x128xf32>
    %104 = tpu.matmul %103, %7, %cst_27 {dimension_numbers = #tpu.dot_dimension_numbers<[1], [0], [0], [1], [0, 0, 1, 1], [], []>} : vector<8x32xbf16>, vector<32x128xbf16>, vector<8x128xf32> -> vector<8x128xf32>
    %105 = arith.addf %102, %104 : vector<8x128xf32>
    %106 = vector.extract_strided_slice %105 {offsets = [0, 0], sizes = [8, 96], strides = [1, 1]} : vector<8x128xf32> to vector<8x96xf32>
    %107 = arith.negf %106 : vector<8x96xf32>
    %108 = math.exp %107 : vector<8x96xf32>
    %cst_28 = arith.constant 1.000000e+00 : f32
    %109 = vector.broadcast %cst_28 : f32 to vector<8x96xf32>
    %110 = arith.addf %109, %108 : vector<8x96xf32>
    %111 = arith.divf %109, %110 : vector<8x96xf32>
    %112 = vector.extract_strided_slice %105 {offsets = [0, 96], sizes = [8, 32], strides = [1, 1]} : vector<8x128xf32> to vector<8x32xf32>
    %113 = math.tanh %112 : vector<8x32xf32>
    %114 = vector.extract_strided_slice %111 {offsets = [0, 0], sizes = [8, 32], strides = [1, 1]} : vector<8x96xf32> to vector<8x32xf32>
    %115 = vector.extract_strided_slice %111 {offsets = [0, 32], sizes = [8, 32], strides = [1, 1]} : vector<8x96xf32> to vector<8x32xf32>
    %116 = vector.extract_strided_slice %111 {offsets = [0, 64], sizes = [8, 32], strides = [1, 1]} : vector<8x96xf32> to vector<8x32xf32>
    %117 = arith.mulf %115, %76 : vector<8x32xf32>
    %118 = arith.mulf %114, %113 : vector<8x32xf32>
    %119 = arith.addf %117, %118 : vector<8x32xf32>
    %120 = math.tanh %119 : vector<8x32xf32>
    %121 = arith.mulf %116, %120 : vector<8x32xf32>
    %cst_29 = arith.constant dense<0.000000e+00> : vector<8x128xf32>
    %122 = tpu.matmul %121, %9, %cst_29 {dimension_numbers = #tpu.dot_dimension_numbers<[1], [0], [0], [1], [0, 0, 1, 1], [], []>} : vector<8x32xf32>, vector<32x128xf32>, vector<8x128xf32> -> vector<8x128xf32>
    %123 = vector.broadcast %10 : vector<1x128xf32> to vector<8x128xf32>
    %124 = arith.addf %122, %123 : vector<8x128xf32>
    %125 = arith.truncf %100 : vector<8x32xf32> to vector<8x32xbf16>
    %cst_30 = arith.constant dense<0.000000e+00> : vector<8x128xf32>
    %126 = tpu.matmul %125, %8, %cst_30 {dimension_numbers = #tpu.dot_dimension_numbers<[1], [0], [0], [1], [0, 0, 1, 1], [], []>} : vector<8x32xbf16>, vector<32x128xbf16>, vector<8x128xf32> -> vector<8x128xf32>
    %127 = arith.addf %124, %126 : vector<8x128xf32>
    %128 = vector.extract_strided_slice %127 {offsets = [0, 0], sizes = [8, 96], strides = [1, 1]} : vector<8x128xf32> to vector<8x96xf32>
    %129 = arith.negf %128 : vector<8x96xf32>
    %130 = math.exp %129 : vector<8x96xf32>
    %cst_31 = arith.constant 1.000000e+00 : f32
    %131 = vector.broadcast %cst_31 : f32 to vector<8x96xf32>
    %132 = arith.addf %131, %130 : vector<8x96xf32>
    %133 = arith.divf %131, %132 : vector<8x96xf32>
    %134 = vector.extract_strided_slice %127 {offsets = [0, 96], sizes = [8, 32], strides = [1, 1]} : vector<8x128xf32> to vector<8x32xf32>
    %135 = math.tanh %134 : vector<8x32xf32>
    %136 = vector.extract_strided_slice %133 {offsets = [0, 0], sizes = [8, 32], strides = [1, 1]} : vector<8x96xf32> to vector<8x32xf32>
    %137 = vector.extract_strided_slice %133 {offsets = [0, 32], sizes = [8, 32], strides = [1, 1]} : vector<8x96xf32> to vector<8x32xf32>
    %138 = vector.extract_strided_slice %133 {offsets = [0, 64], sizes = [8, 32], strides = [1, 1]} : vector<8x96xf32> to vector<8x32xf32>
    %139 = arith.mulf %137, %98 : vector<8x32xf32>
    %140 = arith.mulf %136, %135 : vector<8x32xf32>
    %141 = arith.addf %139, %140 : vector<8x32xf32>
    %142 = math.tanh %141 : vector<8x32xf32>
    %143 = arith.mulf %138, %142 : vector<8x32xf32>
    %144 = vector.extract_strided_slice %6 {offsets = [3, 0, 0], sizes = [1, 8, 128], strides = [1, 1, 1]} : vector<8x8x128xf32> to vector<1x8x128xf32>
    %145 = vector.shape_cast %144 : vector<1x8x128xf32> to vector<8x128xf32>
    %146 = arith.truncf %121 : vector<8x32xf32> to vector<8x32xbf16>
    %cst_32 = arith.constant dense<0.000000e+00> : vector<8x128xf32>
    %147 = tpu.matmul %146, %7, %cst_32 {dimension_numbers = #tpu.dot_dimension_numbers<[1], [0], [0], [1], [0, 0, 1, 1], [], []>} : vector<8x32xbf16>, vector<32x128xbf16>, vector<8x128xf32> -> vector<8x128xf32>
    %148 = arith.addf %145, %147 : vector<8x128xf32>
    %149 = vector.extract_strided_slice %148 {offsets = [0, 0], sizes = [8, 96], strides = [1, 1]} : vector<8x128xf32> to vector<8x96xf32>
    %150 = arith.negf %149 : vector<8x96xf32>
    %151 = math.exp %150 : vector<8x96xf32>
    %cst_33 = arith.constant 1.000000e+00 : f32
    %152 = vector.broadcast %cst_33 : f32 to vector<8x96xf32>
    %153 = arith.addf %152, %151 : vector<8x96xf32>
    %154 = arith.divf %152, %153 : vector<8x96xf32>
    %155 = vector.extract_strided_slice %148 {offsets = [0, 96], sizes = [8, 32], strides = [1, 1]} : vector<8x128xf32> to vector<8x32xf32>
    %156 = math.tanh %155 : vector<8x32xf32>
    %157 = vector.extract_strided_slice %154 {offsets = [0, 0], sizes = [8, 32], strides = [1, 1]} : vector<8x96xf32> to vector<8x32xf32>
    %158 = vector.extract_strided_slice %154 {offsets = [0, 32], sizes = [8, 32], strides = [1, 1]} : vector<8x96xf32> to vector<8x32xf32>
    %159 = vector.extract_strided_slice %154 {offsets = [0, 64], sizes = [8, 32], strides = [1, 1]} : vector<8x96xf32> to vector<8x32xf32>
    %160 = arith.mulf %158, %119 : vector<8x32xf32>
    %161 = arith.mulf %157, %156 : vector<8x32xf32>
    %162 = arith.addf %160, %161 : vector<8x32xf32>
    %163 = math.tanh %162 : vector<8x32xf32>
    %164 = arith.mulf %159, %163 : vector<8x32xf32>
    %cst_34 = arith.constant dense<0.000000e+00> : vector<8x128xf32>
    %165 = tpu.matmul %164, %9, %cst_34 {dimension_numbers = #tpu.dot_dimension_numbers<[1], [0], [0], [1], [0, 0, 1, 1], [], []>} : vector<8x32xf32>, vector<32x128xf32>, vector<8x128xf32> -> vector<8x128xf32>
    %166 = vector.broadcast %10 : vector<1x128xf32> to vector<8x128xf32>
    %167 = arith.addf %165, %166 : vector<8x128xf32>
    %168 = arith.truncf %143 : vector<8x32xf32> to vector<8x32xbf16>
    %cst_35 = arith.constant dense<0.000000e+00> : vector<8x128xf32>
    %169 = tpu.matmul %168, %8, %cst_35 {dimension_numbers = #tpu.dot_dimension_numbers<[1], [0], [0], [1], [0, 0, 1, 1], [], []>} : vector<8x32xbf16>, vector<32x128xbf16>, vector<8x128xf32> -> vector<8x128xf32>
    %170 = arith.addf %167, %169 : vector<8x128xf32>
    %171 = vector.extract_strided_slice %170 {offsets = [0, 0], sizes = [8, 96], strides = [1, 1]} : vector<8x128xf32> to vector<8x96xf32>
    %172 = arith.negf %171 : vector<8x96xf32>
    %173 = math.exp %172 : vector<8x96xf32>
    %cst_36 = arith.constant 1.000000e+00 : f32
    %174 = vector.broadcast %cst_36 : f32 to vector<8x96xf32>
    %175 = arith.addf %174, %173 : vector<8x96xf32>
    %176 = arith.divf %174, %175 : vector<8x96xf32>
    %177 = vector.extract_strided_slice %170 {offsets = [0, 96], sizes = [8, 32], strides = [1, 1]} : vector<8x128xf32> to vector<8x32xf32>
    %178 = math.tanh %177 : vector<8x32xf32>
    %179 = vector.extract_strided_slice %176 {offsets = [0, 0], sizes = [8, 32], strides = [1, 1]} : vector<8x96xf32> to vector<8x32xf32>
    %180 = vector.extract_strided_slice %176 {offsets = [0, 32], sizes = [8, 32], strides = [1, 1]} : vector<8x96xf32> to vector<8x32xf32>
    %181 = vector.extract_strided_slice %176 {offsets = [0, 64], sizes = [8, 32], strides = [1, 1]} : vector<8x96xf32> to vector<8x32xf32>
    %182 = arith.mulf %180, %141 : vector<8x32xf32>
    %183 = arith.mulf %179, %178 : vector<8x32xf32>
    %184 = arith.addf %182, %183 : vector<8x32xf32>
    %185 = math.tanh %184 : vector<8x32xf32>
    %186 = arith.mulf %181, %185 : vector<8x32xf32>
    %187 = vector.extract_strided_slice %6 {offsets = [4, 0, 0], sizes = [1, 8, 128], strides = [1, 1, 1]} : vector<8x8x128xf32> to vector<1x8x128xf32>
    %188 = vector.shape_cast %187 : vector<1x8x128xf32> to vector<8x128xf32>
    %189 = arith.truncf %164 : vector<8x32xf32> to vector<8x32xbf16>
    %cst_37 = arith.constant dense<0.000000e+00> : vector<8x128xf32>
    %190 = tpu.matmul %189, %7, %cst_37 {dimension_numbers = #tpu.dot_dimension_numbers<[1], [0], [0], [1], [0, 0, 1, 1], [], []>} : vector<8x32xbf16>, vector<32x128xbf16>, vector<8x128xf32> -> vector<8x128xf32>
    %191 = arith.addf %188, %190 : vector<8x128xf32>
    %192 = vector.extract_strided_slice %191 {offsets = [0, 0], sizes = [8, 96], strides = [1, 1]} : vector<8x128xf32> to vector<8x96xf32>
    %193 = arith.negf %192 : vector<8x96xf32>
    %194 = math.exp %193 : vector<8x96xf32>
    %cst_38 = arith.constant 1.000000e+00 : f32
    %195 = vector.broadcast %cst_38 : f32 to vector<8x96xf32>
    %196 = arith.addf %195, %194 : vector<8x96xf32>
    %197 = arith.divf %195, %196 : vector<8x96xf32>
    %198 = vector.extract_strided_slice %191 {offsets = [0, 96], sizes = [8, 32], strides = [1, 1]} : vector<8x128xf32> to vector<8x32xf32>
    %199 = math.tanh %198 : vector<8x32xf32>
    %200 = vector.extract_strided_slice %197 {offsets = [0, 0], sizes = [8, 32], strides = [1, 1]} : vector<8x96xf32> to vector<8x32xf32>
    %201 = vector.extract_strided_slice %197 {offsets = [0, 32], sizes = [8, 32], strides = [1, 1]} : vector<8x96xf32> to vector<8x32xf32>
    %202 = vector.extract_strided_slice %197 {offsets = [0, 64], sizes = [8, 32], strides = [1, 1]} : vector<8x96xf32> to vector<8x32xf32>
    %203 = arith.mulf %201, %162 : vector<8x32xf32>
    %204 = arith.mulf %200, %199 : vector<8x32xf32>
    %205 = arith.addf %203, %204 : vector<8x32xf32>
    %206 = math.tanh %205 : vector<8x32xf32>
    %207 = arith.mulf %202, %206 : vector<8x32xf32>
    %cst_39 = arith.constant dense<0.000000e+00> : vector<8x128xf32>
    %208 = tpu.matmul %207, %9, %cst_39 {dimension_numbers = #tpu.dot_dimension_numbers<[1], [0], [0], [1], [0, 0, 1, 1], [], []>} : vector<8x32xf32>, vector<32x128xf32>, vector<8x128xf32> -> vector<8x128xf32>
    %209 = vector.broadcast %10 : vector<1x128xf32> to vector<8x128xf32>
    %210 = arith.addf %208, %209 : vector<8x128xf32>
    %211 = arith.truncf %186 : vector<8x32xf32> to vector<8x32xbf16>
    %cst_40 = arith.constant dense<0.000000e+00> : vector<8x128xf32>
    %212 = tpu.matmul %211, %8, %cst_40 {dimension_numbers = #tpu.dot_dimension_numbers<[1], [0], [0], [1], [0, 0, 1, 1], [], []>} : vector<8x32xbf16>, vector<32x128xbf16>, vector<8x128xf32> -> vector<8x128xf32>
    %213 = arith.addf %210, %212 : vector<8x128xf32>
    %214 = vector.extract_strided_slice %213 {offsets = [0, 0], sizes = [8, 96], strides = [1, 1]} : vector<8x128xf32> to vector<8x96xf32>
    %215 = arith.negf %214 : vector<8x96xf32>
    %216 = math.exp %215 : vector<8x96xf32>
    %cst_41 = arith.constant 1.000000e+00 : f32
    %217 = vector.broadcast %cst_41 : f32 to vector<8x96xf32>
    %218 = arith.addf %217, %216 : vector<8x96xf32>
    %219 = arith.divf %217, %218 : vector<8x96xf32>
    %220 = vector.extract_strided_slice %213 {offsets = [0, 96], sizes = [8, 32], strides = [1, 1]} : vector<8x128xf32> to vector<8x32xf32>
    %221 = math.tanh %220 : vector<8x32xf32>
    %222 = vector.extract_strided_slice %219 {offsets = [0, 0], sizes = [8, 32], strides = [1, 1]} : vector<8x96xf32> to vector<8x32xf32>
    %223 = vector.extract_strided_slice %219 {offsets = [0, 32], sizes = [8, 32], strides = [1, 1]} : vector<8x96xf32> to vector<8x32xf32>
    %224 = vector.extract_strided_slice %219 {offsets = [0, 64], sizes = [8, 32], strides = [1, 1]} : vector<8x96xf32> to vector<8x32xf32>
    %225 = arith.mulf %223, %184 : vector<8x32xf32>
    %226 = arith.mulf %222, %221 : vector<8x32xf32>
    %227 = arith.addf %225, %226 : vector<8x32xf32>
    %228 = math.tanh %227 : vector<8x32xf32>
    %229 = arith.mulf %224, %228 : vector<8x32xf32>
    %230 = vector.extract_strided_slice %6 {offsets = [5, 0, 0], sizes = [1, 8, 128], strides = [1, 1, 1]} : vector<8x8x128xf32> to vector<1x8x128xf32>
    %231 = vector.shape_cast %230 : vector<1x8x128xf32> to vector<8x128xf32>
    %232 = arith.truncf %207 : vector<8x32xf32> to vector<8x32xbf16>
    %cst_42 = arith.constant dense<0.000000e+00> : vector<8x128xf32>
    %233 = tpu.matmul %232, %7, %cst_42 {dimension_numbers = #tpu.dot_dimension_numbers<[1], [0], [0], [1], [0, 0, 1, 1], [], []>} : vector<8x32xbf16>, vector<32x128xbf16>, vector<8x128xf32> -> vector<8x128xf32>
    %234 = arith.addf %231, %233 : vector<8x128xf32>
    %235 = vector.extract_strided_slice %234 {offsets = [0, 0], sizes = [8, 96], strides = [1, 1]} : vector<8x128xf32> to vector<8x96xf32>
    %236 = arith.negf %235 : vector<8x96xf32>
    %237 = math.exp %236 : vector<8x96xf32>
    %cst_43 = arith.constant 1.000000e+00 : f32
    %238 = vector.broadcast %cst_43 : f32 to vector<8x96xf32>
    %239 = arith.addf %238, %237 : vector<8x96xf32>
    %240 = arith.divf %238, %239 : vector<8x96xf32>
    %241 = vector.extract_strided_slice %234 {offsets = [0, 96], sizes = [8, 32], strides = [1, 1]} : vector<8x128xf32> to vector<8x32xf32>
    %242 = math.tanh %241 : vector<8x32xf32>
    %243 = vector.extract_strided_slice %240 {offsets = [0, 0], sizes = [8, 32], strides = [1, 1]} : vector<8x96xf32> to vector<8x32xf32>
    %244 = vector.extract_strided_slice %240 {offsets = [0, 32], sizes = [8, 32], strides = [1, 1]} : vector<8x96xf32> to vector<8x32xf32>
    %245 = vector.extract_strided_slice %240 {offsets = [0, 64], sizes = [8, 32], strides = [1, 1]} : vector<8x96xf32> to vector<8x32xf32>
    %246 = arith.mulf %244, %205 : vector<8x32xf32>
    %247 = arith.mulf %243, %242 : vector<8x32xf32>
    %248 = arith.addf %246, %247 : vector<8x32xf32>
    %249 = math.tanh %248 : vector<8x32xf32>
    %250 = arith.mulf %245, %249 : vector<8x32xf32>
    %cst_44 = arith.constant dense<0.000000e+00> : vector<8x128xf32>
    %251 = tpu.matmul %250, %9, %cst_44 {dimension_numbers = #tpu.dot_dimension_numbers<[1], [0], [0], [1], [0, 0, 1, 1], [], []>} : vector<8x32xf32>, vector<32x128xf32>, vector<8x128xf32> -> vector<8x128xf32>
    %252 = vector.broadcast %10 : vector<1x128xf32> to vector<8x128xf32>
    %253 = arith.addf %251, %252 : vector<8x128xf32>
    %254 = arith.truncf %229 : vector<8x32xf32> to vector<8x32xbf16>
    %cst_45 = arith.constant dense<0.000000e+00> : vector<8x128xf32>
    %255 = tpu.matmul %254, %8, %cst_45 {dimension_numbers = #tpu.dot_dimension_numbers<[1], [0], [0], [1], [0, 0, 1, 1], [], []>} : vector<8x32xbf16>, vector<32x128xbf16>, vector<8x128xf32> -> vector<8x128xf32>
    %256 = arith.addf %253, %255 : vector<8x128xf32>
    %257 = vector.extract_strided_slice %256 {offsets = [0, 0], sizes = [8, 96], strides = [1, 1]} : vector<8x128xf32> to vector<8x96xf32>
    %258 = arith.negf %257 : vector<8x96xf32>
    %259 = math.exp %258 : vector<8x96xf32>
    %cst_46 = arith.constant 1.000000e+00 : f32
    %260 = vector.broadcast %cst_46 : f32 to vector<8x96xf32>
    %261 = arith.addf %260, %259 : vector<8x96xf32>
    %262 = arith.divf %260, %261 : vector<8x96xf32>
    %263 = vector.extract_strided_slice %256 {offsets = [0, 96], sizes = [8, 32], strides = [1, 1]} : vector<8x128xf32> to vector<8x32xf32>
    %264 = math.tanh %263 : vector<8x32xf32>
    %265 = vector.extract_strided_slice %262 {offsets = [0, 0], sizes = [8, 32], strides = [1, 1]} : vector<8x96xf32> to vector<8x32xf32>
    %266 = vector.extract_strided_slice %262 {offsets = [0, 32], sizes = [8, 32], strides = [1, 1]} : vector<8x96xf32> to vector<8x32xf32>
    %267 = vector.extract_strided_slice %262 {offsets = [0, 64], sizes = [8, 32], strides = [1, 1]} : vector<8x96xf32> to vector<8x32xf32>
    %268 = arith.mulf %266, %227 : vector<8x32xf32>
    %269 = arith.mulf %265, %264 : vector<8x32xf32>
    %270 = arith.addf %268, %269 : vector<8x32xf32>
    %271 = math.tanh %270 : vector<8x32xf32>
    %272 = arith.mulf %267, %271 : vector<8x32xf32>
    %273 = vector.extract_strided_slice %6 {offsets = [6, 0, 0], sizes = [1, 8, 128], strides = [1, 1, 1]} : vector<8x8x128xf32> to vector<1x8x128xf32>
    %274 = vector.shape_cast %273 : vector<1x8x128xf32> to vector<8x128xf32>
    %275 = arith.truncf %250 : vector<8x32xf32> to vector<8x32xbf16>
    %cst_47 = arith.constant dense<0.000000e+00> : vector<8x128xf32>
    %276 = tpu.matmul %275, %7, %cst_47 {dimension_numbers = #tpu.dot_dimension_numbers<[1], [0], [0], [1], [0, 0, 1, 1], [], []>} : vector<8x32xbf16>, vector<32x128xbf16>, vector<8x128xf32> -> vector<8x128xf32>
    %277 = arith.addf %274, %276 : vector<8x128xf32>
    %278 = vector.extract_strided_slice %277 {offsets = [0, 0], sizes = [8, 96], strides = [1, 1]} : vector<8x128xf32> to vector<8x96xf32>
    %279 = arith.negf %278 : vector<8x96xf32>
    %280 = math.exp %279 : vector<8x96xf32>
    %cst_48 = arith.constant 1.000000e+00 : f32
    %281 = vector.broadcast %cst_48 : f32 to vector<8x96xf32>
    %282 = arith.addf %281, %280 : vector<8x96xf32>
    %283 = arith.divf %281, %282 : vector<8x96xf32>
    %284 = vector.extract_strided_slice %277 {offsets = [0, 96], sizes = [8, 32], strides = [1, 1]} : vector<8x128xf32> to vector<8x32xf32>
    %285 = math.tanh %284 : vector<8x32xf32>
    %286 = vector.extract_strided_slice %283 {offsets = [0, 0], sizes = [8, 32], strides = [1, 1]} : vector<8x96xf32> to vector<8x32xf32>
    %287 = vector.extract_strided_slice %283 {offsets = [0, 32], sizes = [8, 32], strides = [1, 1]} : vector<8x96xf32> to vector<8x32xf32>
    %288 = vector.extract_strided_slice %283 {offsets = [0, 64], sizes = [8, 32], strides = [1, 1]} : vector<8x96xf32> to vector<8x32xf32>
    %289 = arith.mulf %287, %248 : vector<8x32xf32>
    %290 = arith.mulf %286, %285 : vector<8x32xf32>
    %291 = arith.addf %289, %290 : vector<8x32xf32>
    %292 = math.tanh %291 : vector<8x32xf32>
    %293 = arith.mulf %288, %292 : vector<8x32xf32>
    %cst_49 = arith.constant dense<0.000000e+00> : vector<8x128xf32>
    %294 = tpu.matmul %293, %9, %cst_49 {dimension_numbers = #tpu.dot_dimension_numbers<[1], [0], [0], [1], [0, 0, 1, 1], [], []>} : vector<8x32xf32>, vector<32x128xf32>, vector<8x128xf32> -> vector<8x128xf32>
    %295 = vector.broadcast %10 : vector<1x128xf32> to vector<8x128xf32>
    %296 = arith.addf %294, %295 : vector<8x128xf32>
    %297 = arith.truncf %272 : vector<8x32xf32> to vector<8x32xbf16>
    %cst_50 = arith.constant dense<0.000000e+00> : vector<8x128xf32>
    %298 = tpu.matmul %297, %8, %cst_50 {dimension_numbers = #tpu.dot_dimension_numbers<[1], [0], [0], [1], [0, 0, 1, 1], [], []>} : vector<8x32xbf16>, vector<32x128xbf16>, vector<8x128xf32> -> vector<8x128xf32>
    %299 = arith.addf %296, %298 : vector<8x128xf32>
    %300 = vector.extract_strided_slice %299 {offsets = [0, 0], sizes = [8, 96], strides = [1, 1]} : vector<8x128xf32> to vector<8x96xf32>
    %301 = arith.negf %300 : vector<8x96xf32>
    %302 = math.exp %301 : vector<8x96xf32>
    %cst_51 = arith.constant 1.000000e+00 : f32
    %303 = vector.broadcast %cst_51 : f32 to vector<8x96xf32>
    %304 = arith.addf %303, %302 : vector<8x96xf32>
    %305 = arith.divf %303, %304 : vector<8x96xf32>
    %306 = vector.extract_strided_slice %299 {offsets = [0, 96], sizes = [8, 32], strides = [1, 1]} : vector<8x128xf32> to vector<8x32xf32>
    %307 = math.tanh %306 : vector<8x32xf32>
    %308 = vector.extract_strided_slice %305 {offsets = [0, 0], sizes = [8, 32], strides = [1, 1]} : vector<8x96xf32> to vector<8x32xf32>
    %309 = vector.extract_strided_slice %305 {offsets = [0, 32], sizes = [8, 32], strides = [1, 1]} : vector<8x96xf32> to vector<8x32xf32>
    %310 = vector.extract_strided_slice %305 {offsets = [0, 64], sizes = [8, 32], strides = [1, 1]} : vector<8x96xf32> to vector<8x32xf32>
    %311 = arith.mulf %309, %270 : vector<8x32xf32>
    %312 = arith.mulf %308, %307 : vector<8x32xf32>
    %313 = arith.addf %311, %312 : vector<8x32xf32>
    %314 = math.tanh %313 : vector<8x32xf32>
    %315 = arith.mulf %310, %314 : vector<8x32xf32>
    %316 = vector.extract_strided_slice %6 {offsets = [7, 0, 0], sizes = [1, 8, 128], strides = [1, 1, 1]} : vector<8x8x128xf32> to vector<1x8x128xf32>
    %317 = vector.shape_cast %316 : vector<1x8x128xf32> to vector<8x128xf32>
    %318 = arith.truncf %293 : vector<8x32xf32> to vector<8x32xbf16>
    %cst_52 = arith.constant dense<0.000000e+00> : vector<8x128xf32>
    %319 = tpu.matmul %318, %7, %cst_52 {dimension_numbers = #tpu.dot_dimension_numbers<[1], [0], [0], [1], [0, 0, 1, 1], [], []>} : vector<8x32xbf16>, vector<32x128xbf16>, vector<8x128xf32> -> vector<8x128xf32>
    %320 = arith.addf %317, %319 : vector<8x128xf32>
    %321 = vector.extract_strided_slice %320 {offsets = [0, 0], sizes = [8, 96], strides = [1, 1]} : vector<8x128xf32> to vector<8x96xf32>
    %322 = arith.negf %321 : vector<8x96xf32>
    %323 = math.exp %322 : vector<8x96xf32>
    %cst_53 = arith.constant 1.000000e+00 : f32
    %324 = vector.broadcast %cst_53 : f32 to vector<8x96xf32>
    %325 = arith.addf %324, %323 : vector<8x96xf32>
    %326 = arith.divf %324, %325 : vector<8x96xf32>
    %327 = vector.extract_strided_slice %320 {offsets = [0, 96], sizes = [8, 32], strides = [1, 1]} : vector<8x128xf32> to vector<8x32xf32>
    %328 = math.tanh %327 : vector<8x32xf32>
    %329 = vector.extract_strided_slice %326 {offsets = [0, 0], sizes = [8, 32], strides = [1, 1]} : vector<8x96xf32> to vector<8x32xf32>
    %330 = vector.extract_strided_slice %326 {offsets = [0, 32], sizes = [8, 32], strides = [1, 1]} : vector<8x96xf32> to vector<8x32xf32>
    %331 = vector.extract_strided_slice %326 {offsets = [0, 64], sizes = [8, 32], strides = [1, 1]} : vector<8x96xf32> to vector<8x32xf32>
    %332 = arith.mulf %330, %291 : vector<8x32xf32>
    %333 = arith.mulf %329, %328 : vector<8x32xf32>
    %334 = arith.addf %332, %333 : vector<8x32xf32>
    %335 = math.tanh %334 : vector<8x32xf32>
    %336 = arith.mulf %331, %335 : vector<8x32xf32>
    %cst_54 = arith.constant dense<0.000000e+00> : vector<8x128xf32>
    %337 = tpu.matmul %336, %9, %cst_54 {dimension_numbers = #tpu.dot_dimension_numbers<[1], [0], [0], [1], [0, 0, 1, 1], [], []>} : vector<8x32xf32>, vector<32x128xf32>, vector<8x128xf32> -> vector<8x128xf32>
    %338 = vector.broadcast %10 : vector<1x128xf32> to vector<8x128xf32>
    %339 = arith.addf %337, %338 : vector<8x128xf32>
    %340 = arith.truncf %315 : vector<8x32xf32> to vector<8x32xbf16>
    %cst_55 = arith.constant dense<0.000000e+00> : vector<8x128xf32>
    %341 = tpu.matmul %340, %8, %cst_55 {dimension_numbers = #tpu.dot_dimension_numbers<[1], [0], [0], [1], [0, 0, 1, 1], [], []>} : vector<8x32xbf16>, vector<32x128xbf16>, vector<8x128xf32> -> vector<8x128xf32>
    %342 = arith.addf %339, %341 : vector<8x128xf32>
    %343 = vector.extract_strided_slice %342 {offsets = [0, 0], sizes = [8, 96], strides = [1, 1]} : vector<8x128xf32> to vector<8x96xf32>
    %344 = arith.negf %343 : vector<8x96xf32>
    %345 = math.exp %344 : vector<8x96xf32>
    %cst_56 = arith.constant 1.000000e+00 : f32
    %346 = vector.broadcast %cst_56 : f32 to vector<8x96xf32>
    %347 = arith.addf %346, %345 : vector<8x96xf32>
    %348 = arith.divf %346, %347 : vector<8x96xf32>
    %349 = vector.extract_strided_slice %342 {offsets = [0, 96], sizes = [8, 32], strides = [1, 1]} : vector<8x128xf32> to vector<8x32xf32>
    %350 = math.tanh %349 : vector<8x32xf32>
    %351 = vector.extract_strided_slice %348 {offsets = [0, 0], sizes = [8, 32], strides = [1, 1]} : vector<8x96xf32> to vector<8x32xf32>
    %352 = vector.extract_strided_slice %348 {offsets = [0, 32], sizes = [8, 32], strides = [1, 1]} : vector<8x96xf32> to vector<8x32xf32>
    %353 = vector.extract_strided_slice %348 {offsets = [0, 64], sizes = [8, 32], strides = [1, 1]} : vector<8x96xf32> to vector<8x32xf32>
    %354 = arith.mulf %352, %313 : vector<8x32xf32>
    %355 = arith.mulf %351, %350 : vector<8x32xf32>
    %356 = arith.addf %354, %355 : vector<8x32xf32>
    %357 = math.tanh %356 : vector<8x32xf32>
    %358 = arith.mulf %353, %357 : vector<8x32xf32>
    %c0_57 = arith.constant 0 : index
    %c0_58 = arith.constant 0 : index
    %359 = vector.load %arg7[%c0_57, %c0_58] : memref<32x16xf32, #tpu.memory_space<vmem>>, vector<32x16xf32>
    %cst_59 = arith.constant dense<0.000000e+00> : vector<8x16xf32>
    %360 = tpu.matmul %358, %359, %cst_59 {dimension_numbers = #tpu.dot_dimension_numbers<[1], [0], [0], [1], [0, 0, 1, 1], [], []>} : vector<8x32xf32>, vector<32x16xf32>, vector<8x16xf32> -> vector<8x16xf32>
    %c0_60 = arith.constant 0 : index
    %c0_61 = arith.constant 0 : index
    %361 = vector.load %arg8[%c0_60, %c0_61] : memref<1x16xf32, #tpu.memory_space<vmem>>, vector<1x16xf32>
    %362 = vector.broadcast %361 : vector<1x16xf32> to vector<8x16xf32>
    %363 = arith.addf %360, %362 : vector<8x16xf32>
    %cst_62 = arith.constant 0.000000e+00 : f32
    %364 = vector.broadcast %cst_62 : f32 to vector<8x16xf32>
    %365 = arith.maximumf %363, %364 : vector<8x16xf32>
    %c0_63 = arith.constant 0 : index
    %c0_64 = arith.constant 0 : index
    %366 = vector.load %arg9[%c0_63, %c0_64] : memref<16x16xf32, #tpu.memory_space<vmem>>, vector<16x16xf32>
    %cst_65 = arith.constant dense<0.000000e+00> : vector<8x16xf32>
    %367 = tpu.matmul %365, %366, %cst_65 {dimension_numbers = #tpu.dot_dimension_numbers<[1], [0], [0], [1], [0, 0, 1, 1], [], []>} : vector<8x16xf32>, vector<16x16xf32>, vector<8x16xf32> -> vector<8x16xf32>
    %c0_66 = arith.constant 0 : index
    %c0_67 = arith.constant 0 : index
    %368 = vector.load %arg10[%c0_66, %c0_67] : memref<1x16xf32, #tpu.memory_space<vmem>>, vector<1x16xf32>
    %369 = vector.broadcast %368 : vector<1x16xf32> to vector<8x16xf32>
    %370 = arith.addf %367, %369 : vector<8x16xf32>
    %cst_68 = arith.constant 0.000000e+00 : f32
    %371 = vector.broadcast %cst_68 : f32 to vector<8x16xf32>
    %372 = arith.maximumf %370, %371 : vector<8x16xf32>
    %c0_69 = arith.constant 0 : index
    %c0_70 = arith.constant 0 : index
    %373 = vector.load %arg11[%c0_69, %c0_70] : memref<1x16xf32, #tpu.memory_space<vmem>>, vector<1x16xf32>
    %374 = vector.broadcast %373 : vector<1x16xf32> to vector<8x16xf32>
    %375 = arith.mulf %372, %374 : vector<8x16xf32>
    %cst_71 = arith.constant dense<0.000000e+00> : vector<8xf32>
    %376 = vector.multi_reduction <add>, %375, %cst_71 [1] : vector<8x16xf32> to vector<8xf32>
    %377 = vector.shape_cast %376 : vector<8xf32> to vector<8x1xf32>
    %c0_72 = arith.constant 0 : index
    %c0_73 = arith.constant 0 : index
    %378 = vector.load %arg12[%c0_72, %c0_73] : memref<1x1xf32, #tpu.memory_space<vmem>>, vector<1x1xf32>
    %379 = vector.broadcast %378 : vector<1x1xf32> to vector<8x1xf32>
    %380 = arith.addf %377, %379 : vector<8x1xf32>
    %c0_74 = arith.constant 0 : index
    %c0_75 = arith.constant 0 : index
    %381 = vector.load %arg13[%c0_74, %c0_75] : memref<8x1xf32, #tpu.memory_space<vmem>>, vector<8x1xf32>
    tpu.vector_store %arg13[%c0_74, %c0_75], %380 {strides = array<i32>} : memref<8x1xf32, #tpu.memory_space<vmem>>, vector<8x1xf32>,
    return
  }
}

</mosaic_0001>

<bundles_post_ra>
// kernel: lstm_regression_forward.1
= control target key start
LH: loop header
LB: loop body
LE: loop exit
PB: predicated region body
PF: predicated region fallthrough
CT: control target
= control target key end

     0   :  { %vm88_vm0 = vcmask 1043456   ;;  %vm63_vm1 = vcmask 31744   ;;  %v2737_v1 = vmov 0.0   ;;  %vm2738_vm2 = vmmov 0   ;;  %s2740_s19 = smov 32   ;;  %s3330_s1 = inlined_call_operand.vmem [shape: f32[4,128], index: 1, kind: input, shape index: {}]   ;;  %s3331_s0 = inlined_call_operand.vmem [shape: f32[64,4], index: 0, kind: input, shape index: {}]   ;;  %s3332_s2 = inlined_call_operand.vmem [shape: bf16[32,128], index: 2, kind: input, shape index: {}]   ;;  %s3333_s3 = inlined_call_operand.vmem [shape: f32[1,128], index: 3, kind: input, shape index: {}]   ;;  %s3334_s4 = inlined_call_operand.vmem [shape: f32[32,128], index: 4, kind: input, shape index: {}]   ;;  %s3335_s5 = inlined_call_operand.vmem [shape: bf16[32,128], index: 5, kind: input, shape index: {}]   ;;  %s3336_s6 = inlined_call_operand.vmem [shape: f32[1,128], index: 6, kind: input, shape index: {}]   ;;  %s3337_s7 = inlined_call_operand.vmem [shape: f32[32,16], index: 7, kind: input, shape index: {}]   ;;  %s3338_s9 = inlined_call_operand.vmem [shape: f32[16,16], index: 9, kind: input, shape index: {}]   ;;  %s3339_s8 = inlined_call_operand.vmem [shape: f32[1,16], index: 8, kind: input, shape index: {}]   ;;  %s3340_s12 = inlined_call_operand.<no memory space> [shape: f32[1,1], index: 12, kind: input, shape index: {}]   ;;  %s3341_s10 = inlined_call_operand.vmem [shape: f32[1,16], index: 10, kind: input, shape index: {}]   ;;  %s3342_s11 = inlined_call_operand.vmem [shape: f32[1,16], index: 11, kind: input, shape index: {}]   ;;  %s3343_s13 = inlined_call_operand.vmem [shape: f32[8,1], index: 13, kind: output, shape index: {}]  }
   0x1   :  { %v55_v0 = vld [vmem:[%s3330_s1] sm:$0xf]  ;;  %2356 = vmatprep.subr.bf16.mxu1 %v2737_v1  ;;  %2360 = vmatprep.mubr.msk.bf16.mxu1 %vm2738_vm2, %v2737_v1  ;;  %v2825_v3 = vld [vmem:[%s3332_s2 + $0x8] sm:$0xff]   ;;  %v2739_v6 = vmov 0   ;;  %v49_v26 = vld [vmem:[%s3331_s0 + $0x10] sm:$0xff]  ;;  %vm222_vm3 = vcmask 261120  }
   0x2   :  { %v47_v2 = vld [vmem:[%s3331_s0] sm:$0xff]  ;;  %2342 = vmatprep.subr.msk.mxu0 %vm88_vm0, %v55_v0  ;;  %v48_v4 = vld [vmem:[%s3331_s0 + $0x8] sm:$0xff]  ;;  %2357 = vmatpush3.bf16.msra.mxu1 %v2825_v3  ;;  %v50_v27 = vld [vmem:[%s3331_s0 + $0x18] sm:$0xff]  ;;  %vm2078_vm4 = vcmask 130048   ;;  %vm2172_vm5 = vcmask 7168  }
   0x3   :  { %2344 = vmatprep.mubr.msk.f32.mxu0 %vm63_vm1, %v47_v2  ;;  %2343 = vmatpush3.msk.msra.mxu0 %vm88_vm0, %v55_v0  ;;  %v2835_v5 = vld [vmem:[%s3332_s2] sm:$0xff]   ;;  %v2870_v29 = vld [vmem:[%s3334_s4 + $0x18] sm:$0xff]  ;;  %v2875_v30 = vld [vmem:[%s3334_s4 + $0x10] sm:$0xff] }
   0x4   :  { %2345 = vmatmul.mubr.msk.f32.vlgmr.msra.gmra.mxu0 %vm63_vm1, %v48_v4  ;;  %2358 = vmatprep.subr.bf16.mxu1 %v2737_v1  ;;  %v2849_v8 = vld [vmem:[%s3333_s3] ss:$0 sm:$0xff]  ;;  %v2882_v31 = vld [vmem:[%s3335_s5 + $0x8] sm:$0xff]   ;;  %v53_v34 = vld [vmem:[%s3331_s0 + $0x30] sm:$0xff] }
   0x5   :  { %2375 = vmatprep.subr.bf16.mxu0 %v2737_v1  ;;  %v51_v28 = vld [vmem:[%s3331_s0 + $0x20] sm:$0xff]  ;;  %2347 = vmatprep.mubr.msk.f32.mxu0 %vm63_vm1, %v49_v26  ;;  %v52_v32 = vld [vmem:[%s3331_s0 + $0x28] sm:$0xff]  ;;  %v54_v37 = vld [vmem:[%s3331_s0 + $0x38] sm:$0xff]  ;;  %s2741_s0 = smov 64  }
   0x6   :  { %2359 = vmatpush3.bf16.msra.mxu1 %v2835_v5  ;;  %v2892_v33 = vld [vmem:[%s3334_s4 + $0x8] sm:$0xff]  ;;  %2376 = vmatpush3.bf16.msra.mxu0 %v2882_v31  ;;  %v2903_v35 = vld [vmem:[%s3334_s4] sm:$0xff] }
   0x7   :  { %2364 = vmatprep.subr.mxu1 %v2737_v1  ;;  %2377 = vmatprep.subr.bf16.mxu0 %v2737_v1  ;;  %v2909_v36 = vld [vmem:[%s3335_s5] sm:$0xff]  }
   0x8   :  { %2348 = vmatmul.mubr.msk.f32.gmra.mxu0 %vm63_vm1, %v50_v27  ;;  %v2968_v54 = vld [vmem:[%s3336_s6] ss:$0 sm:$0xff] }
   0x9   :  { %2361 = vmatmul.mubr.bf16.vlgmr.msra.gmra.mxu1 %v2739_v6  ;;  %2350 = vmatprep.mubr.msk.f32.mxu0 %vm63_vm1, %v51_v28 }
   0xa   :  { %2372 = vmatprep.mubr.msk.f32.mxu1 %vm2738_vm2, %v2737_v1  ;;  %2365 = vmatpush3.msra.mxu1 %v2870_v29 }
   0xb   :  { %2366 = vmatprep.subr.mxu1 %v2737_v1  ;;  %2378 = vmatpush3.bf16.msra.mxu0 %v2909_v36 }
   0xc   :  { %2367 = vmatpush3.msra.mxu1 %v2875_v30  ;;  %2351 = vmatmul.mubr.msk.f32.gmra.mxu0 %vm63_vm1, %v52_v32 }
   0xd   :  { %2368 = vmatprep.subr.mxu1 %v2737_v1  ;;  %2353 = vmatprep.mubr.msk.f32.mxu0 %vm63_vm1, %v53_v34 }
   0xe   :  { %2369 = vmatpush3.msra.mxu1 %v2892_v33  ;;  %2391 = vmatprep.subr.mxu0 %v2737_v1 }
   0xf   :  { %2370 = vmatprep.subr.mxu1 %v2737_v1 }
  0x10   :  { %2371 = vmatpush3.msra.mxu1 %v2903_v35  ;;  %2354 = vmatmul.mubr.msk.f32.gmra.mxu0 %vm63_vm1, %v54_v37 }
  0x11   :  { %2383 = vmatprep.subr.bf16.mxu1 %v2737_v1  ;;  %2379 = vmatprep.mubr.msk.bf16.mxu0 %vm2738_vm2, %v2737_v1 }
  0x14   :  { %2380 = vmatmul.mubr.bf16.vlgmr.msra.gmra.mxu0 %v2739_v6 }
  0x15   :  { %2392 = vmatpush3.msra.mxu0 %v2870_v29  ;;  %2399 = vmatprep.mubr.msk.f32.mxu0 %vm2738_vm2, %v2737_v1 }
  0x16   :  { %2393 = vmatprep.subr.mxu0 %v2737_v1 }
  0x17   :  { %2394 = vmatpush3.msra.mxu0 %v2875_v30 }
  0x18   :  { %2395 = vmatprep.subr.mxu0 %v2737_v1 }
  0x19   :  { %2396 = vmatpush3.msra.mxu0 %v2892_v33 }
  0x1a   :  { %2397 = vmatprep.subr.mxu0 %v2737_v1 }
  0x1b   :  { %2398 = vmatpush3.msra.mxu0 %v2903_v35 }
  0x1c   :  { %2410 = vmatprep.subr.bf16.mxu0 %v2737_v1 }
  0xc4   :  { %v2844_v7 = vpop.f32.mrf.mxu0 }
  0xc5   :  { %v164_v59 = vadd.f32 %v2844_v7, %v2849_v8 }
  0xc6   :  { %v158_v9 = vpop.f32.mrf.mxu0 }
  0xc7   :  { %v159_v10 = vadd.f32 %v2849_v8, %v158_v9 }
  0xc8   :  { %v2953_v44 = vpop.f32.mrf.mxu0 }
  0xc9   :  { %v260_v11 = vpop.f32.mrf.mxu1 }
  0xca   :  { %v266_v12 = vadd.f32 %v260_v11, %v159_v10  ;;  %v2955_v45 = vpop.f32.mrf.mxu0 }
  0xcb   :  { %v2362_v13 = vpop.f32.mrf.mxu1 }
  0xcc   :  { %2599 = vtanh.f32 %v266_v12  ;;  %v2190_v17 = vmul.f32 -1.442695, %v266_v12  ;;  %v2957_v46 = vpop.f32.mrf.mxu0 }
  0xcd   :  { %v263_v14 = vpop.f32.mrf.mxu1 }
  0xce   :  { %2601 = vpow2.f32 %v2190_v17  ;;  %v2959_v47 = vpop.f32.mrf.mxu0 }
  0xcf   :  { %v2363_v15 = vpop.f32.mrf.mxu1 }
  0xd0   :  { %v2961_v48 = vpop.f32.mrf.mxu0 }
  0xd2   :  { %v2963_v49 = vpop.f32.mrf.mxu0 }
  0xd4   :  { %v418_v50 = vpop.f32.mrf.mxu0 }
  0xd6   :  { %v2381_v51 = vpop.f32.mrf.mxu0 }
  0xd8   :  { %v421_v52 = vpop.f32.mrf.mxu0 }
  0xd9   :  { %v2600_v16 = vpop.eup %2599 }
  0xda   :  { %276 = vrot.lane.b32.xlu0 %v2600_v16, %s2740_s19  ;;  %v2382_v53 = vpop.f32.mrf.mxu0 }
  0xdb   :  { %v2602_v18 = vpop.eup %2601 }
  0xdc   :  { %v270_v19 = vadd.f32 1.0, %v2602_v18 }
  0xde   :  { %2603 = vrcp.f32 %v270_v19 }
  0xeb   :  { %v2604_v20 = vpop.eup %2603 }
  0xec   :  { %v274_v23 = vmul.f32 0.0, %v2604_v20 }
 0x14c   :  { %v277_v21 = vpop.permute.xlu0 %276 }
 0x14d   :  { %v279_v22 = vmul.f32 %v2604_v20, %v277_v21 }
 0x14f   :  { %281 = vrot.lane.b32.xlu0 %v279_v22, %s2740_s19 }
 0x1c1   :  { %v282_v24 = vpop.permute.xlu0 %281 }
 0x1c2   :  { %v2854_v25 = vadd.f32 %v282_v24, %v274_v23 }
 0x1c4   :  { %2605 = vtanh.f32 %v2854_v25 }
 0x1d1   :  { %v2606_v38 = vpop.eup %2605 }
 0x1d2   :  { %287 = vrot.lane.b32.xlu1 %v2606_v38, %s2740_s19 }
 0x244   :  { %v288_v39 = vpop.permute.xlu1 %287 }
 0x245   :  { %v290_v40 = vmul.f32 %v2604_v20, %v288_v39 }
 0x247   :  { %v449_v41 = vpack.c.bf16 %v290_v40, %v290_v40  ;;  %298 = vrot.lane.b32.xlu1 %v290_v40, %s2741_s0 }
 0x249   :  { %451 = vrot.lane.b32.xlu0 %v449_v41, %s2741_s0 }
 0x2b9   :  { %v299_v42 = vpop.permute.xlu1 %298 }
 0x2ba   :  { %2373 = vmatmul.mubr.msk.f32.vlgmr.msra.gmra.mxu1 %vm222_vm3, %v299_v42 }
 0x2bb   :  { %2384 = vmatpush3.bf16.msra.mxu1 %v2825_v3  ;;  %2387 = vmatprep.mubr.msk.bf16.mxu1 %vm2738_vm2, %v2737_v1  ;;  %v452_v43 = vpop.permute.xlu0 %451 }
 0x2bc   :  { %2385 = vmatprep.subr.bf16.mxu1 %v2737_v1 }
 0x2bf   :  { %2386 = vmatpush3.bf16.msra.mxu1 %v2835_v5 }
 0x2c0   :  { %2402 = vmatprep.subr.bf16.mxu1 %v2737_v1 }
 0x2c2   :  { %2388 = vmatmul.mubr.msk.bf16.vlgmr.msra.gmra.mxu1 %vm222_vm3, %v452_v43 }
 0x2c3   :  { %2403 = vmatpush3.bf16.msra.mxu1 %v2882_v31  ;;  %2406 = vmatprep.mubr.msk.bf16.mxu1 %vm2738_vm2, %v2737_v1 }
 0x2c4   :  { %2404 = vmatprep.subr.bf16.mxu1 %v2737_v1 }
 0x2c7   :  { %2405 = vmatpush3.bf16.msra.mxu1 %v2909_v36 }
 0x2c8   :  { %2418 = vmatprep.subr.mxu1 %v2737_v1 }
 0x37a   :  { %v368_v55 = vpop.f32.mrf.mxu1 }
 0x37b   :  { %v369_v56 = vadd.f32 %v2968_v54, %v368_v55  ;;  %v169_v55 = vadd.f32 %v2849_v8, %v2955_v45 }
 0x37c   :  { %v2374_v57 = vpop.f32.mrf.mxu1 }
 0x37d   :  { %v424_v58 = vadd.f32 %v418_v50, %v369_v56 }
 0x37f   :  { %2607 = vtanh.f32 %v424_v58  ;;  %v2195_v6 = vmul.f32 -1.442695, %v424_v58 }
 0x382   :  { %v490_v60 = vpop.f32.mrf.mxu1 }
 0x383   :  { %v496_v61 = vadd.f32 %v490_v60, %v164_v59 }
 0x384   :  { %v2389_v62 = vpop.f32.mrf.mxu1 }
 0x385   :  { %2609 = vtanh.f32 %v496_v61  ;;  %v2197_v9 = vmul.f32 -1.442695, %v496_v61 }
 0x386   :  { %v493_v63 = vpop.f32.mrf.mxu1  ;;  %2611 = vpow2.f32 %v2195_v6 }
 0x387   :  { %2613 = vpow2.f32 %v2197_v9 }
 0x388   :  { %v2390_v0 = vpop.f32.mrf.mxu1 }
 0x38c   :  { %v2608_v2 = vpop.eup %2607 }
 0x38d   :  { %434 = vrot.lane.b32.xlu0 %v2608_v2, %s2740_s19 }
 0x392   :  { %v2610_v4 = vpop.eup %2609 }
 0x393   :  { %506 = vrot.lane.b32.xlu1 %v2610_v4, %s2740_s19  ;;  %v2612_v10 = vpop.eup %2611 }
 0x394   :  { %v428_v11 = vadd.f32 1.0, %v2612_v10  ;;  %v2614_v12 = vpop.eup %2613 }
 0x395   :  { %v500_v7 = vadd.f32 1.0, %v2614_v12 }
 0x396   :  { %2615 = vrcp.f32 %v428_v11 }
 0x397   :  { %2617 = vrcp.f32 %v500_v7 }
 0x3a3   :  { %v2616_v13 = vpop.eup %2615 }
 0x3a4   :  { %v2618_v16 = vpop.eup %2617  ;;  %v432_v19 = vmul.f32 0.0, %v2616_v13 }
 0x3a5   :  { %v504_v22 = vmul.f32 %v2618_v16, %v2854_v25 }
 0x3ff   :  { %v435_v14 = vpop.permute.xlu0 %434 }
 0x400   :  { %v437_v15 = vmul.f32 %v2616_v13, %v435_v14 }
 0x402   :  { %439 = vrot.lane.b32.xlu0 %v437_v15, %s2740_s19 }
 0x405   :  { %v507_v17 = vpop.permute.xlu1 %506 }
 0x406   :  { %v509_v18 = vmul.f32 %v2618_v16, %v507_v17 }
 0x408   :  { %511 = vrot.lane.b32.xlu1 %v509_v18, %s2740_s19 }
 0x474   :  { %v440_v20 = vpop.permute.xlu0 %439 }
 0x475   :  { %v2977_v21 = vadd.f32 %v440_v20, %v432_v19 }
 0x477   :  { %2619 = vtanh.f32 %v2977_v21 }
 0x47a   :  { %v512_v23 = vpop.permute.xlu1 %511 }
 0x47b   :  { %v2981_v24 = vadd.f32 %v512_v23, %v504_v22 }
 0x47d   :  { %2621 = vtanh.f32 %v2981_v24 }
 0x484   :  { %v2620_v26 = vpop.eup %2619 }
 0x485   :  { %445 = vrot.lane.b32.xlu0 %v2620_v26, %s2740_s19 }
 0x48a   :  { %v2622_v27 = vpop.eup %2621 }
 0x48b   :  { %517 = vrot.lane.b32.xlu1 %v2622_v27, %s2740_s19 }
 0x4f7   :  { %v446_v28 = vpop.permute.xlu0 %445 }
 0x4f8   :  { %v448_v34 = vmul.f32 %v2616_v13, %v446_v28 }
 0x4fa   :  { %v596_v39 = vpack.c.bf16 %v448_v34, %v448_v34 }
 0x4fd   :  { %v518_v32 = vpop.permute.xlu1 %517 }
 0x4fe   :  { %v520_v37 = vmul.f32 %v2618_v16, %v518_v32 }
 0x500   :  { %v668_v38 = vpack.c.bf16 %v520_v37, %v520_v37  ;;  %522 = vrot.lane.b32.xlu1 %v520_v37, %s2741_s0 }
 0x502   :  { %670 = vrot.lane.b32.xlu0 %v668_v38, %s2741_s0 }
 0x504   :  { %598 = vrot.lane.b32.xlu1 %v596_v39, %s2741_s0 }
 0x572   :  { %v523_v25 = vpop.permute.xlu1 %522 }
 0x573   :  { %2400 = vmatmul.mubr.msk.f32.vlgmr.msra.gmra.mxu0 %vm222_vm3, %v523_v25 }
 0x574   :  { %2411 = vmatpush3.bf16.msra.mxu0 %v2825_v3  ;;  %2414 = vmatprep.mubr.msk.bf16.mxu0 %vm2738_vm2, %v2737_v1  ;;  %v671_v41 = vpop.permute.xlu0 %670 }
 0x575   :  { %2412 = vmatprep.subr.bf16.mxu0 %v2737_v1 }
 0x576   :  { %v599_v40 = vpop.permute.xlu1 %598 }
 0x577   :  { %2407 = vmatmul.mubr.msk.bf16.vlgmr.msra.gmra.mxu1 %vm222_vm3, %v599_v40 }
 0x578   :  { %2413 = vmatpush3.bf16.msra.mxu0 %v2835_v5  ;;  %2419 = vmatpush3.msra.mxu1 %v2870_v29 }
 0x579   :  { %2420 = vmatprep.subr.mxu1 %v2737_v1  ;;  %2429 = vmatprep.subr.bf16.mxu0 %v2737_v1 }
 0x57a   :  { %2421 = vmatpush3.msra.mxu1 %v2875_v30  ;;  %2426 = vmatprep.mubr.msk.f32.mxu1 %vm2738_vm2, %v2737_v1 }
 0x57b   :  { %2415 = vmatmul.mubr.msk.bf16.vlgmr.msra.gmra.mxu0 %vm222_vm3, %v671_v41  ;;  %2422 = vmatprep.subr.mxu1 %v2737_v1 }
 0x57c   :  { %2423 = vmatpush3.msra.mxu1 %v2892_v33  ;;  %2430 = vmatpush3.bf16.msra.mxu0 %v2882_v31 }
 0x57d   :  { %2424 = vmatprep.subr.mxu1 %v2737_v1  ;;  %2431 = vmatprep.subr.bf16.mxu0 %v2737_v1 }
 0x57e   :  { %2425 = vmatpush3.msra.mxu1 %v2903_v35  ;;  %2433 = vmatprep.mubr.msk.bf16.mxu0 %vm2738_vm2, %v2737_v1 }
 0x57f   :  { %2437 = vmatprep.subr.bf16.mxu1 %v2737_v1 }
 0x580   :  { %2432 = vmatpush3.bf16.msra.mxu0 %v2909_v36 }
 0x581   :  { %2445 = vmatprep.subr.mxu0 %v2737_v1 }
 0x633   :  { %v592_v42 = vpop.f32.mrf.mxu0 }
 0x634   :  { %v593_v50 = vadd.f32 %v2968_v54, %v592_v42 }
 0x635   :  { %v2401_v43 = vpop.f32.mrf.mxu0 }
 0x637   :  { %v637_v51 = vpop.f32.mrf.mxu1 }
 0x638   :  { %v643_v52 = vadd.f32 %v637_v51, %v593_v50  ;;  %v174_v51 = vadd.f32 %v2953_v44, %v2849_v8 }
 0x639   :  { %v2408_v53 = vpop.f32.mrf.mxu1 }
 0x63a   :  { %2623 = vtanh.f32 %v643_v52  ;;  %v2200_v2 = vmul.f32 -1.442695, %v643_v52 }
 0x63b   :  { %v709_v56 = vpop.f32.mrf.mxu0  ;;  %v640_v57 = vpop.f32.mrf.mxu1 }
 0x63c   :  { %v715_v58 = vadd.f32 %v709_v56, %v169_v55 }
 0x63d   :  { %v2416_v59 = vpop.f32.mrf.mxu0  ;;  %v2409_v60 = vpop.f32.mrf.mxu1 }
 0x63e   :  { %2625 = vtanh.f32 %v715_v58  ;;  %v2202_v4 = vmul.f32 -1.442695, %v715_v58 }
 0x63f   :  { %v712_v61 = vpop.f32.mrf.mxu0  ;;  %2627 = vpow2.f32 %v2200_v2 }
 0x640   :  { %2629 = vpow2.f32 %v2202_v4 }
 0x641   :  { %v2417_v62 = vpop.f32.mrf.mxu0 }
 0x647   :  { %v2624_v63 = vpop.eup %2623 }
 0x648   :  { %653 = vrot.lane.b32.xlu1 %v2624_v63, %s2740_s19 }
 0x64b   :  { %v2626_v0 = vpop.eup %2625 }
 0x64c   :  { %725 = vrot.lane.b32.xlu0 %v2626_v0, %s2740_s19  ;;  %v2628_v45 = vpop.eup %2627 }
 0x64d   :  { %v647_v6 = vadd.f32 1.0, %v2628_v45  ;;  %v2630_v9 = vpop.eup %2629 }
 0x64e   :  { %v719_v10 = vadd.f32 1.0, %v2630_v9 }
 0x64f   :  { %2631 = vrcp.f32 %v647_v6 }
 0x650   :  { %2633 = vrcp.f32 %v719_v10 }
 0x65c   :  { %v2632_v11 = vpop.eup %2631 }
 0x65d   :  { %v2634_v13 = vpop.eup %2633  ;;  %v651_v16 = vmul.f32 %v2632_v11, %v2977_v21 }
 0x65e   :  { %v723_v19 = vmul.f32 %v2634_v13, %v2981_v24 }
 0x6ba   :  { %v654_v12 = vpop.permute.xlu1 %653 }
 0x6bb   :  { %v656_v7 = vmul.f32 %v2632_v11, %v654_v12 }
 0x6bd   :  { %658 = vrot.lane.b32.xlu1 %v656_v7, %s2740_s19 }
 0x6be   :  { %v726_v14 = vpop.permute.xlu0 %725 }
 0x6bf   :  { %v728_v15 = vmul.f32 %v2634_v13, %v726_v14 }
 0x6c1   :  { %730 = vrot.lane.b32.xlu0 %v728_v15, %s2740_s19 }
 0x72f   :  { %v659_v17 = vpop.permute.xlu1 %658 }
 0x730   :  { %v3022_v18 = vadd.f32 %v659_v17, %v651_v16 }
 0x732   :  { %2635 = vtanh.f32 %v3022_v18 }
 0x733   :  { %v731_v20 = vpop.permute.xlu0 %730 }
 0x734   :  { %v3026_v22 = vadd.f32 %v731_v20, %v723_v19 }
 0x736   :  { %2637 = vtanh.f32 %v3026_v22 }
 0x73f   :  { %v2636_v23 = vpop.eup %2635 }
 0x740   :  { %664 = vrot.lane.b32.xlu1 %v2636_v23, %s2740_s19 }
 0x743   :  { %v2638_v26 = vpop.eup %2637 }
 0x744   :  { %736 = vrot.lane.b32.xlu0 %v2638_v26, %s2740_s19 }
 0x7b2   :  { %v665_v27 = vpop.permute.xlu1 %664 }
 0x7b3   :  { %v667_v28 = vmul.f32 %v2632_v11, %v665_v27 }
 0x7b5   :  { %v815_v37 = vpack.c.bf16 %v667_v28, %v667_v28 }
 0x7b6   :  { %v737_v21 = vpop.permute.xlu0 %736 }
 0x7b7   :  { %v739_v32 = vmul.f32 %v2634_v13, %v737_v21 }
 0x7b9   :  { %v887_v34 = vpack.c.bf16 %v739_v32, %v739_v32  ;;  %741 = vrot.lane.b32.xlu0 %v739_v32, %s2741_s0 }
 0x7bb   :  { %889 = vrot.lane.b32.xlu1 %v887_v34, %s2741_s0 }
 0x7bd   :  { %817 = vrot.lane.b32.xlu0 %v815_v37, %s2741_s0 }
 0x82b   :  { %v742_v24 = vpop.permute.xlu0 %741 }
 0x82c   :  { %2427 = vmatmul.mubr.msk.f32.vlgmr.msra.gmra.mxu1 %vm222_vm3, %v742_v24 }
 0x82d   :  { %2438 = vmatpush3.bf16.msra.mxu1 %v2825_v3  ;;  %2441 = vmatprep.mubr.msk.bf16.mxu1 %vm2738_vm2, %v2737_v1  ;;  %v890_v39 = vpop.permute.xlu1 %889 }
 0x82e   :  { %2439 = vmatprep.subr.bf16.mxu1 %v2737_v1 }
 0x82f   :  { %v818_v38 = vpop.permute.xlu0 %817 }
 0x830   :  { %2434 = vmatmul.mubr.msk.bf16.vlgmr.msra.gmra.mxu0 %vm222_vm3, %v818_v38 }
 0x831   :  { %2440 = vmatpush3.bf16.msra.mxu1 %v2835_v5  ;;  %2446 = vmatpush3.msra.mxu0 %v2870_v29 }
 0x832   :  { %2447 = vmatprep.subr.mxu0 %v2737_v1  ;;  %2456 = vmatprep.subr.bf16.mxu1 %v2737_v1 }
 0x833   :  { %2448 = vmatpush3.msra.mxu0 %v2875_v30  ;;  %2453 = vmatprep.mubr.msk.f32.mxu0 %vm2738_vm2, %v2737_v1 }
 0x834   :  { %2442 = vmatmul.mubr.msk.bf16.vlgmr.msra.gmra.mxu1 %vm222_vm3, %v890_v39  ;;  %2449 = vmatprep.subr.mxu0 %v2737_v1 }
 0x835   :  { %2450 = vmatpush3.msra.mxu0 %v2892_v33  ;;  %2457 = vmatpush3.bf16.msra.mxu1 %v2882_v31 }
 0x836   :  { %2451 = vmatprep.subr.mxu0 %v2737_v1  ;;  %2458 = vmatprep.subr.bf16.mxu1 %v2737_v1 }
 0x837   :  { %2452 = vmatpush3.msra.mxu0 %v2903_v35  ;;  %2460 = vmatprep.mubr.msk.bf16.mxu1 %vm2738_vm2, %v2737_v1 }
 0x838   :  { %2464 = vmatprep.subr.bf16.mxu0 %v2737_v1 }
 0x839   :  { %2459 = vmatpush3.bf16.msra.mxu1 %v2909_v36 }
 0x83a   :  { %2472 = vmatprep.subr.mxu1 %v2737_v1 }
 0x8ec   :  { %v811_v25 = vpop.f32.mrf.mxu1 }
 0x8ed   :  { %v812_v41 = vadd.f32 %v2968_v54, %v811_v25 }
 0x8ee   :  { %v2428_v40 = vpop.f32.mrf.mxu1 }
 0x8f0   :  { %v856_v42 = vpop.f32.mrf.mxu0 }
 0x8f1   :  { %v862_v43 = vadd.f32 %v856_v42, %v812_v41  ;;  %v179_v41 = vadd.f32 %v2849_v8, %v2959_v47 }
 0x8f2   :  { %v2435_v50 = vpop.f32.mrf.mxu0 }
 0x8f3   :  { %2639 = vtanh.f32 %v862_v43  ;;  %v2205_v62 = vmul.f32 -1.442695, %v862_v43 }
 0x8f4   :  { %v928_v52 = vpop.f32.mrf.mxu1  ;;  %v859_v53 = vpop.f32.mrf.mxu0 }
 0x8f5   :  { %v934_v55 = vadd.f32 %v928_v52, %v174_v51 }
 0x8f6   :  { %v2443_v56 = vpop.f32.mrf.mxu1  ;;  %v2436_v57 = vpop.f32.mrf.mxu0 }
 0x8f7   :  { %2641 = vtanh.f32 %v934_v55  ;;  %v2207_v63 = vmul.f32 -1.442695, %v934_v55 }
 0x8f8   :  { %v931_v58 = vpop.f32.mrf.mxu1  ;;  %2643 = vpow2.f32 %v2205_v62 }
 0x8f9   :  { %2645 = vpow2.f32 %v2207_v63 }
 0x8fa   :  { %v2444_v59 = vpop.f32.mrf.mxu1 }
 0x900   :  { %v2640_v60 = vpop.eup %2639 }
 0x901   :  { %872 = vrot.lane.b32.xlu0 %v2640_v60, %s2740_s19 }
 0x904   :  { %v2642_v61 = vpop.eup %2641 }
 0x905   :  { %944 = vrot.lane.b32.xlu1 %v2642_v61, %s2740_s19  ;;  %v2644_v44 = vpop.eup %2643 }
 0x906   :  { %v866_v0 = vadd.f32 1.0, %v2644_v44  ;;  %v2646_v2 = vpop.eup %2645 }
 0x907   :  { %v938_v4 = vadd.f32 1.0, %v2646_v2 }
 0x908   :  { %2647 = vrcp.f32 %v866_v0 }
 0x909   :  { %2649 = vrcp.f32 %v938_v4 }
 0x915   :  { %v2648_v45 = vpop.eup %2647 }
 0x916   :  { %v2650_v10 = vpop.eup %2649  ;;  %v870_v7 = vmul.f32 %v2648_v45, %v3022_v18 }
 0x917   :  { %v942_v15 = vmul.f32 %v2650_v10, %v3026_v22 }
 0x973   :  { %v873_v6 = vpop.permute.xlu0 %872 }
 0x974   :  { %v875_v9 = vmul.f32 %v2648_v45, %v873_v6 }
 0x976   :  { %877 = vrot.lane.b32.xlu0 %v875_v9, %s2740_s19 }
 0x977   :  { %v945_v11 = vpop.permute.xlu1 %944 }
 0x978   :  { %v947_v12 = vmul.f32 %v2650_v10, %v945_v11 }
 0x97a   :  { %949 = vrot.lane.b32.xlu1 %v947_v12, %s2740_s19 }
 0x9e8   :  { %v878_v13 = vpop.permute.xlu0 %877 }
 0x9e9   :  { %v3067_v14 = vadd.f32 %v878_v13, %v870_v7 }
 0x9eb   :  { %2651 = vtanh.f32 %v3067_v14 }
 0x9ec   :  { %v950_v16 = vpop.permute.xlu1 %949 }
 0x9ed   :  { %v3071_v17 = vadd.f32 %v950_v16, %v942_v15 }
 0x9ef   :  { %2653 = vtanh.f32 %v3071_v17 }
 0x9f8   :  { %v2652_v19 = vpop.eup %2651 }
 0x9f9   :  { %883 = vrot.lane.b32.xlu0 %v2652_v19, %s2740_s19 }
 0x9fc   :  { %v2654_v20 = vpop.eup %2653 }
 0x9fd   :  { %955 = vrot.lane.b32.xlu1 %v2654_v20, %s2740_s19 }
 0xa6b   :  { %v884_v23 = vpop.permute.xlu0 %883 }
 0xa6c   :  { %v886_v26 = vmul.f32 %v2648_v45, %v884_v23 }
 0xa6e   :  { %v1034_v28 = vpack.c.bf16 %v886_v26, %v886_v26 }
 0xa6f   :  { %v956_v18 = vpop.permute.xlu1 %955 }
 0xa70   :  { %v958_v27 = vmul.f32 %v2650_v10, %v956_v18 }
 0xa72   :  { %v1106_v21 = vpack.c.bf16 %v958_v27, %v958_v27  ;;  %960 = vrot.lane.b32.xlu1 %v958_v27, %s2741_s0 }
 0xa74   :  { %1108 = vrot.lane.b32.xlu0 %v1106_v21, %s2741_s0 }
 0xa76   :  { %1036 = vrot.lane.b32.xlu1 %v1034_v28, %s2741_s0 }
 0xae4   :  { %v961_v22 = vpop.permute.xlu1 %960 }
 0xae5   :  { %2454 = vmatmul.mubr.msk.f32.vlgmr.msra.gmra.mxu0 %vm222_vm3, %v961_v22 }
 0xae6   :  { %2465 = vmatpush3.bf16.msra.mxu0 %v2825_v3  ;;  %2468 = vmatprep.mubr.msk.bf16.mxu0 %vm2738_vm2, %v2737_v1  ;;  %v1109_v34 = vpop.permute.xlu0 %1108 }
 0xae7   :  { %2466 = vmatprep.subr.bf16.mxu0 %v2737_v1 }
 0xae8   :  { %v1037_v32 = vpop.permute.xlu1 %1036 }
 0xae9   :  { %2461 = vmatmul.mubr.msk.bf16.vlgmr.msra.gmra.mxu1 %vm222_vm3, %v1037_v32 }
 0xaea   :  { %2467 = vmatpush3.bf16.msra.mxu0 %v2835_v5  ;;  %2473 = vmatpush3.msra.mxu1 %v2870_v29 }
 0xaeb   :  { %2474 = vmatprep.subr.mxu1 %v2737_v1  ;;  %2483 = vmatprep.subr.bf16.mxu0 %v2737_v1 }
 0xaec   :  { %2475 = vmatpush3.msra.mxu1 %v2875_v30  ;;  %2480 = vmatprep.mubr.msk.f32.mxu1 %vm2738_vm2, %v2737_v1 }
 0xaed   :  { %2469 = vmatmul.mubr.msk.bf16.vlgmr.msra.gmra.mxu0 %vm222_vm3, %v1109_v34  ;;  %2476 = vmatprep.subr.mxu1 %v2737_v1  ;;  %v184_v34 = vadd.f32 %v2957_v46, %v2849_v8 }
 0xaee   :  { %2477 = vmatpush3.msra.mxu1 %v2892_v33  ;;  %2484 = vmatpush3.bf16.msra.mxu0 %v2882_v31 }
 0xaef   :  { %2478 = vmatprep.subr.mxu1 %v2737_v1  ;;  %2485 = vmatprep.subr.bf16.mxu0 %v2737_v1 }
 0xaf0   :  { %2479 = vmatpush3.msra.mxu1 %v2903_v35  ;;  %2487 = vmatprep.mubr.msk.bf16.mxu0 %vm2738_vm2, %v2737_v1 }
 0xaf1   :  { %2491 = vmatprep.subr.bf16.mxu1 %v2737_v1 }
 0xaf2   :  { %2486 = vmatpush3.bf16.msra.mxu0 %v2909_v36 }
 0xaf3   :  { %2499 = vmatprep.subr.mxu0 %v2737_v1 }
 0xba5   :  { %v1030_v37 = vpop.f32.mrf.mxu0 }
 0xba6   :  { %v1031_v38 = vadd.f32 %v2968_v54, %v1030_v37 }
 0xba7   :  { %v2455_v24 = vpop.f32.mrf.mxu0 }
 0xba9   :  { %v1075_v39 = vpop.f32.mrf.mxu1 }
 0xbaa   :  { %v1081_v25 = vadd.f32 %v1075_v39, %v1031_v38 }
 0xbab   :  { %v2462_v40 = vpop.f32.mrf.mxu1 }
 0xbac   :  { %2655 = vtanh.f32 %v1081_v25  ;;  %v2210_v58 = vmul.f32 -1.442695, %v1081_v25 }
 0xbad   :  { %v1147_v42 = vpop.f32.mrf.mxu0  ;;  %v1078_v43 = vpop.f32.mrf.mxu1 }
 0xbae   :  { %v1153_v50 = vadd.f32 %v1147_v42, %v179_v41 }
 0xbaf   :  { %v2470_v51 = vpop.f32.mrf.mxu0  ;;  %v2463_v52 = vpop.f32.mrf.mxu1 }
 0xbb0   :  { %2657 = vtanh.f32 %v1153_v50  ;;  %v2212_v59 = vmul.f32 -1.442695, %v1153_v50 }
 0xbb1   :  { %v1150_v53 = vpop.f32.mrf.mxu0  ;;  %2659 = vpow2.f32 %v2210_v58 }
 0xbb2   :  { %2661 = vpow2.f32 %v2212_v59 }
 0xbb3   :  { %v2471_v55 = vpop.f32.mrf.mxu0 }
 0xbb9   :  { %v2656_v56 = vpop.eup %2655 }
 0xbba   :  { %1091 = vrot.lane.b32.xlu1 %v2656_v56, %s2740_s19 }
 0xbbd   :  { %v2658_v57 = vpop.eup %2657 }
 0xbbe   :  { %1163 = vrot.lane.b32.xlu0 %v2658_v57, %s2740_s19  ;;  %v2660_v47 = vpop.eup %2659 }
 0xbbf   :  { %v1085_v60 = vadd.f32 1.0, %v2660_v47  ;;  %v2662_v61 = vpop.eup %2661 }
 0xbc0   :  { %v1157_v62 = vadd.f32 1.0, %v2662_v61 }
 0xbc1   :  { %2663 = vrcp.f32 %v1085_v60 }
 0xbc2   :  { %2665 = vrcp.f32 %v1157_v62 }
 0xbce   :  { %v2664_v63 = vpop.eup %2663 }
 0xbcf   :  { %v2666_v2 = vpop.eup %2665  ;;  %v1089_v6 = vmul.f32 %v2664_v63, %v3067_v14 }
 0xbd0   :  { %v1161_v11 = vmul.f32 %v2666_v2, %v3071_v17 }
 0xc2c   :  { %v1092_v44 = vpop.permute.xlu1 %1091 }
 0xc2d   :  { %v1094_v0 = vmul.f32 %v2664_v63, %v1092_v44 }
 0xc2f   :  { %1096 = vrot.lane.b32.xlu1 %v1094_v0, %s2740_s19 }
 0xc30   :  { %v1164_v4 = vpop.permute.xlu0 %1163 }
 0xc31   :  { %v1166_v45 = vmul.f32 %v2666_v2, %v1164_v4 }
 0xc33   :  { %1168 = vrot.lane.b32.xlu0 %v1166_v45, %s2740_s19 }
 0xca1   :  { %v1097_v9 = vpop.permute.xlu1 %1096 }
 0xca2   :  { %v3112_v10 = vadd.f32 %v1097_v9, %v1089_v6 }
 0xca4   :  { %2667 = vtanh.f32 %v3112_v10 }
 0xca5   :  { %v1169_v12 = vpop.permute.xlu0 %1168 }
 0xca6   :  { %v3116_v7 = vadd.f32 %v1169_v12, %v1161_v11 }
 0xca8   :  { %2669 = vtanh.f32 %v3116_v7 }
 0xcb1   :  { %v2668_v13 = vpop.eup %2667 }
 0xcb2   :  { %1102 = vrot.lane.b32.xlu1 %v2668_v13, %s2740_s19  ;;  %v3173_v13 = vld [vmem:[%s3332_s2 + $0x8] sm:$0xff]  }
 0xcb5   :  { %v2670_v15 = vpop.eup %2669 }
 0xcb6   :  { %1174 = vrot.lane.b32.xlu0 %v2670_v15, %s2740_s19 }
 0xd24   :  { %v1103_v16 = vpop.permute.xlu1 %1102 }
 0xd25   :  { %v1105_v19 = vmul.f32 %v2664_v63, %v1103_v16  ;;  %v3183_v16 = vld [vmem:[%s3332_s2] sm:$0xff]  }
 0xd27   :  { %v1253_v18 = vpack.c.bf16 %v1105_v19, %v1105_v19 }
 0xd28   :  { %v1175_v14 = vpop.permute.xlu0 %1174 }
 0xd29   :  { %v1177_v20 = vmul.f32 %v2666_v2, %v1175_v14 }
 0xd2b   :  { %v1325_v23 = vpack.c.bf16 %v1177_v20, %v1177_v20  ;;  %1179 = vrot.lane.b32.xlu0 %v1177_v20, %s2741_s0 }
 0xd2d   :  { %1327 = vrot.lane.b32.xlu1 %v1325_v23, %s2741_s0 }
 0xd2f   :  { %1255 = vrot.lane.b32.xlu0 %v1253_v18, %s2741_s0 }
 0xd9d   :  { %v1180_v17 = vpop.permute.xlu0 %1179 }
 0xd9e   :  { %2481 = vmatmul.mubr.msk.f32.vlgmr.msra.gmra.mxu1 %vm222_vm3, %v1180_v17 }
 0xd9f   :  { %2492 = vmatpush3.bf16.msra.mxu1 %v2825_v3  ;;  %2495 = vmatprep.mubr.msk.bf16.mxu1 %vm2738_vm2, %v2737_v1  ;;  %v1328_v27 = vpop.permute.xlu1 %1327 }
 0xda0   :  { %2493 = vmatprep.subr.bf16.mxu1 %v2737_v1 }
 0xda1   :  { %v1256_v26 = vpop.permute.xlu0 %1255 }
 0xda2   :  { %2488 = vmatmul.mubr.msk.bf16.vlgmr.msra.gmra.mxu0 %vm222_vm3, %v1256_v26 }
 0xda3   :  { %2494 = vmatpush3.bf16.msra.mxu1 %v2835_v5  ;;  %2500 = vmatpush3.msra.mxu0 %v2870_v29 }
 0xda4   :  { %2501 = vmatprep.subr.mxu0 %v2737_v1  ;;  %2510 = vmatprep.subr.bf16.mxu1 %v2737_v1 }
 0xda5   :  { %2502 = vmatpush3.msra.mxu0 %v2875_v30  ;;  %2507 = vmatprep.mubr.msk.f32.mxu0 %vm2738_vm2, %v2737_v1 }
 0xda6   :  { %2496 = vmatmul.mubr.msk.bf16.vlgmr.msra.gmra.mxu1 %vm222_vm3, %v1328_v27  ;;  %2503 = vmatprep.subr.mxu0 %v2737_v1 }
 0xda7   :  { %2504 = vmatpush3.msra.mxu0 %v2892_v33  ;;  %2511 = vmatpush3.bf16.msra.mxu1 %v2882_v31 }
 0xda8   :  { %2505 = vmatprep.subr.mxu0 %v2737_v1  ;;  %2512 = vmatprep.subr.bf16.mxu1 %v2737_v1 }
 0xda9   :  { %2506 = vmatpush3.msra.mxu0 %v2903_v35  ;;  %2514 = vmatprep.mubr.msk.bf16.mxu1 %vm2738_vm2, %v2737_v1 }
 0xdaa   :  { %2518 = vmatprep.subr.bf16.mxu0 %v2737_v1 }
 0xdab   :  { %2513 = vmatpush3.bf16.msra.mxu1 %v2909_v36 }
 0xdac   :  { %2526 = vmatprep.subr.mxu1 %v2737_v1 }
 0xe5e   :  { %v1249_v3 = vpop.f32.mrf.mxu1 }
 0xe5f   :  { %v1250_v21 = vadd.f32 %v2968_v54, %v1249_v3 }
 0xe60   :  { %v2482_v5 = vpop.f32.mrf.mxu1 }
 0xe62   :  { %v1294_v28 = vpop.f32.mrf.mxu0 }
 0xe63   :  { %v1300_v22 = vadd.f32 %v1294_v28, %v1250_v21 }
 0xe64   :  { %v2489_v32 = vpop.f32.mrf.mxu0 }
 0xe65   :  { %2671 = vtanh.f32 %v1300_v22  ;;  %v2215_v50 = vmul.f32 -1.442695, %v1300_v22 }
 0xe66   :  { %v1366_v37 = vpop.f32.mrf.mxu1  ;;  %v1297_v24 = vpop.f32.mrf.mxu0 }
 0xe67   :  { %v1372_v38 = vadd.f32 %v1366_v37, %v184_v34 }
 0xe68   :  { %v2497_v39 = vpop.f32.mrf.mxu1  ;;  %v2490_v25 = vpop.f32.mrf.mxu0 }
 0xe69   :  { %2673 = vtanh.f32 %v1372_v38  ;;  %v2217_v51 = vmul.f32 -1.442695, %v1372_v38 }
 0xe6a   :  { %v1369_v40 = vpop.f32.mrf.mxu1  ;;  %2675 = vpow2.f32 %v2215_v50 }
 0xe6b   :  { %2677 = vpow2.f32 %v2217_v51 }
 0xe6c   :  { %v2498_v41 = vpop.f32.mrf.mxu1 }
 0xe72   :  { %v2672_v42 = vpop.eup %2671 }
 0xe73   :  { %1310 = vrot.lane.b32.xlu0 %v2672_v42, %s2740_s19 }
 0xe76   :  { %v2674_v43 = vpop.eup %2673 }
 0xe77   :  { %1382 = vrot.lane.b32.xlu1 %v2674_v43, %s2740_s19  ;;  %v2676_v8 = vpop.eup %2675 }
 0xe78   :  { %v1304_v46 = vadd.f32 1.0, %v2676_v8  ;;  %v2678_v52 = vpop.eup %2677 }
 0xe79   :  { %v1376_v53 = vadd.f32 1.0, %v2678_v52 }
 0xe7a   :  { %2679 = vrcp.f32 %v1304_v46 }
 0xe7b   :  { %2681 = vrcp.f32 %v1376_v53 }
 0xe87   :  { %v2680_v55 = vpop.eup %2679 }
 0xe88   :  { %v2682_v58 = vpop.eup %2681  ;;  %v1308_v60 = vmul.f32 %v2680_v55, %v3112_v10 }
 0xe89   :  { %v1380_v63 = vmul.f32 %v2682_v58, %v3116_v7 }
 0xee5   :  { %v1311_v56 = vpop.permute.xlu0 %1310 }
 0xee6   :  { %v1313_v57 = vmul.f32 %v2680_v55, %v1311_v56 }
 0xee8   :  { %1315 = vrot.lane.b32.xlu0 %v1313_v57, %s2740_s19 }
 0xee9   :  { %v1383_v59 = vpop.permute.xlu1 %1382 }
 0xeea   :  { %v1385_v47 = vmul.f32 %v2682_v58, %v1383_v59 }
 0xeec   :  { %1387 = vrot.lane.b32.xlu1 %v1385_v47, %s2740_s19 }
 0xf5a   :  { %v1316_v61 = vpop.permute.xlu0 %1315 }
 0xf5b   :  { %v3157_v62 = vadd.f32 %v1316_v61, %v1308_v60 }
 0xf5d   :  { %2683 = vtanh.f32 %v3157_v62 }
 0xf5e   :  { %v1388_v44 = vpop.permute.xlu1 %1387 }
 0xf5f   :  { %v3161_v0 = vadd.f32 %v1388_v44, %v1380_v63  ;;  %v2730_v63 = vld [vmem:[%s3334_s4 + $0x18] sm:$0xff]  ;;  %v2731_v44 = vld [vmem:[%s3334_s4 + $0x10] sm:$0xff] }
 0xf61   :  { %2685 = vtanh.f32 %v3161_v0 }
 0xf6a   :  { %v2684_v2 = vpop.eup %2683 }
 0xf6b   :  { %1321 = vrot.lane.b32.xlu0 %v2684_v2, %s2740_s19  ;;  %v2733_v2 = vld [vmem:[%s3334_s4] sm:$0xff] }
 0xf6e   :  { %v2686_v4 = vpop.eup %2685 }
 0xf6f   :  { %1393 = vrot.lane.b32.xlu1 %v2686_v4, %s2740_s19 }
 0xfdd   :  { %v1322_v45 = vpop.permute.xlu0 %1321 }
 0xfde   :  { %v1324_v9 = vmul.f32 %v2680_v55, %v1322_v45  ;;  %v2734_v45 = vld [vmem:[%s3335_s5 + $0x8] sm:$0xff]  }
 0xfe0   :  { %v1472_v12 = vpack.c.bf16 %v1324_v9, %v1324_v9 }
 0xfe1   :  { %v1394_v6 = vpop.permute.xlu1 %1393 }
 0xfe2   :  { %v1396_v10 = vmul.f32 %v2682_v58, %v1394_v6  ;;  %v2735_v6 = vld [vmem:[%s3335_s5] sm:$0xff]  }
 0xfe4   :  { %v1544_v11 = vpack.c.bf16 %v1396_v10, %v1396_v10  ;;  %1398 = vrot.lane.b32.xlu1 %v1396_v10, %s2741_s0 }
 0xfe6   :  { %1546 = vrot.lane.b32.xlu0 %v1544_v11, %s2741_s0 }
 0xfe8   :  { %1474 = vrot.lane.b32.xlu1 %v1472_v12, %s2741_s0 }
0x1056   :  { %v1399_v7 = vpop.permute.xlu1 %1398 }
0x1057   :  { %2508 = vmatmul.mubr.msk.f32.vlgmr.msra.gmra.mxu0 %vm222_vm3, %v1399_v7 }
0x1058   :  { %2519 = vmatpush3.bf16.msra.mxu0 %v3173_v13  ;;  %2522 = vmatprep.mubr.msk.bf16.mxu0 %vm2738_vm2, %v2737_v1  ;;  %v1547_v14 = vpop.permute.xlu0 %1546 }
0x1059   :  { %2520 = vmatprep.subr.bf16.mxu0 %v2737_v1 }
0x105a   :  { %v1475_v15 = vpop.permute.xlu1 %1474 }
0x105b   :  { %2515 = vmatmul.mubr.msk.bf16.vlgmr.msra.gmra.mxu1 %vm222_vm3, %v1475_v15 }
0x105c   :  { %2521 = vmatpush3.bf16.msra.mxu0 %v3183_v16  ;;  %2527 = vmatpush3.msra.mxu1 %v2870_v29 }
0x105d   :  { %2537 = vmatprep.subr.bf16.mxu0 %v2737_v1  ;;  %2528 = vmatprep.subr.mxu1 %v2737_v1 }
0x105e   :  { %2529 = vmatpush3.msra.mxu1 %v2875_v30  ;;  %2534 = vmatprep.mubr.msk.f32.mxu1 %vm2738_vm2, %v2737_v1 }
0x105f   :  { %2523 = vmatmul.mubr.msk.bf16.vlgmr.msra.gmra.mxu0 %vm222_vm3, %v1547_v14  ;;  %2530 = vmatprep.subr.mxu1 %v2737_v1 }
0x1060   :  { %2538 = vmatpush3.bf16.msra.mxu0 %v2882_v31  ;;  %2531 = vmatpush3.msra.mxu1 %v2892_v33 }
0x1061   :  { %2539 = vmatprep.subr.bf16.mxu0 %v2737_v1  ;;  %2532 = vmatprep.subr.mxu1 %v2737_v1 }
0x1062   :  { %2533 = vmatpush3.msra.mxu1 %v2903_v35  ;;  %2541 = vmatprep.mubr.msk.bf16.mxu0 %vm2738_vm2, %v2737_v1  ;;  %v3208_v35 = vld [vmem:[%s3333_s3] ss:$0 sm:$0xff] }
0x1063   :  { %2545 = vmatprep.subr.bf16.mxu1 %v2737_v1  ;;  %v189_v23 = vadd.f32 %v3208_v35, %v2963_v49  ;;  %v194_v14 = vadd.f32 %v3208_v35, %v2961_v48 }
0x1064   :  { %2540 = vmatpush3.bf16.msra.mxu0 %v2909_v36 }
0x1065   :  { %2553 = vmatprep.subr.mxu0 %v2737_v1 }
0x1117   :  { %v1468_v29 = vpop.f32.mrf.mxu0 }
0x1118   :  { %v1469_v31 = vadd.f32 %v2968_v54, %v1468_v29 }
0x1119   :  { %v2509_v30 = vpop.f32.mrf.mxu0 }
0x111b   :  { %v1513_v33 = vpop.f32.mrf.mxu1 }
0x111c   :  { %v1519_v19 = vadd.f32 %v1513_v33, %v1469_v31 }
0x111d   :  { %v2516_v20 = vpop.f32.mrf.mxu1 }
0x111e   :  { %2687 = vtanh.f32 %v1519_v19  ;;  %v2220_v22 = vmul.f32 -1.442695, %v1519_v19 }
0x111f   :  { %v1585_v18 = vpop.f32.mrf.mxu0  ;;  %v1516_v36 = vpop.f32.mrf.mxu1 }
0x1120   :  { %v1591_v17 = vadd.f32 %v1585_v18, %v189_v23 }
0x1121   :  { %v2524_v26 = vpop.f32.mrf.mxu0  ;;  %v2517_v27 = vpop.f32.mrf.mxu1 }
0x1122   :  { %2689 = vtanh.f32 %v1591_v17  ;;  %v2222_v32 = vmul.f32 -1.442695, %v1591_v17 }
0x1123   :  { %v1588_v3 = vpop.f32.mrf.mxu0  ;;  %2691 = vpow2.f32 %v2220_v22 }
0x1124   :  { %2693 = vpow2.f32 %v2222_v32 }
0x1125   :  { %v2525_v5 = vpop.f32.mrf.mxu0 }
0x112b   :  { %v2688_v21 = vpop.eup %2687 }
0x112c   :  { %1529 = vrot.lane.b32.xlu1 %v2688_v21, %s2740_s19 }
0x112f   :  { %v2690_v28 = vpop.eup %2689 }
0x1130   :  { %1601 = vrot.lane.b32.xlu0 %v2690_v28, %s2740_s19  ;;  %v2692_v49 = vpop.eup %2691 }
0x1131   :  { %v1523_v34 = vadd.f32 1.0, %v2692_v49  ;;  %v2694_v37 = vpop.eup %2693 }
0x1132   :  { %v1595_v24 = vadd.f32 1.0, %v2694_v37 }
0x1133   :  { %2695 = vrcp.f32 %v1523_v34 }
0x1134   :  { %2697 = vrcp.f32 %v1595_v24 }
0x1140   :  { %v2696_v38 = vpop.eup %2695 }
0x1141   :  { %v2698_v40 = vpop.eup %2697  ;;  %v1527_v43 = vmul.f32 %v2696_v38, %v3157_v62 }
0x1142   :  { %v1599_v8 = vmul.f32 %v2698_v40, %v3161_v0  ;;  %v2732_v0 = vld [vmem:[%s3334_s4 + $0x8] sm:$0xff] }
0x119e   :  { %v1530_v39 = vpop.permute.xlu1 %1529 }
0x119f   :  { %v1532_v25 = vmul.f32 %v2696_v38, %v1530_v39 }
0x11a1   :  { %1534 = vrot.lane.b32.xlu1 %v1532_v25, %s2740_s19 }
0x11a2   :  { %v1602_v41 = vpop.permute.xlu0 %1601 }
0x11a3   :  { %v1604_v42 = vmul.f32 %v2698_v40, %v1602_v41 }
0x11a5   :  { %1606 = vrot.lane.b32.xlu0 %v1604_v42, %s2740_s19 }
0x1213   :  { %v1535_v50 = vpop.permute.xlu1 %1534 }
0x1214   :  { %v3217_v51 = vadd.f32 %v1535_v50, %v1527_v43 }
0x1216   :  { %2699 = vtanh.f32 %v3217_v51 }
0x1217   :  { %v1607_v46 = vpop.permute.xlu0 %1606 }
0x1218   :  { %v3221_v52 = vadd.f32 %v1607_v46, %v1599_v8 }
0x121a   :  { %2701 = vtanh.f32 %v3221_v52 }
0x1223   :  { %v2700_v53 = vpop.eup %2699 }
0x1224   :  { %1540 = vrot.lane.b32.xlu1 %v2700_v53, %s2740_s19 }
0x1227   :  { %v2702_v55 = vpop.eup %2701 }
0x1228   :  { %1612 = vrot.lane.b32.xlu0 %v2702_v55, %s2740_s19  ;;  %v2736_v55 = vld [vmem:[%s3336_s6] ss:$0 sm:$0xff] }
0x1296   :  { %v1541_v56 = vpop.permute.xlu1 %1540 }
0x1297   :  { %v1543_v57 = vmul.f32 %v2696_v38, %v1541_v56 }
0x1299   :  { %v1691_v58 = vpack.c.bf16 %v1543_v57, %v1543_v57 }
0x129a   :  { %v1613_v59 = vpop.permute.xlu0 %1612 }
0x129b   :  { %v1615_v47 = vmul.f32 %v2698_v40, %v1613_v59  ;;  %1693 = vrot.lane.b32.xlu1 %v1691_v58, %s2741_s0 }
0x129d   :  { %1617 = vrot.lane.b32.xlu0 %v1615_v47, %s2741_s0  ;;  %v1763_v60 = vpack.c.bf16 %v1615_v47, %v1615_v47 }
0x12a1   :  { %1765 = vrot.lane.b32.xlu0 %v1763_v60, %s2741_s0 }
0x130d   :  { %v1694_v61 = vpop.permute.xlu1 %1693 }
0x130e   :  { %2542 = vmatmul.mubr.msk.bf16.vlgmr.msra.gmra.mxu0 %vm222_vm3, %v1694_v61 }
0x130f   :  { %v1618_v62 = vpop.permute.xlu0 %1617  ;;  %2554 = vmatpush3.msra.mxu0 %v2730_v63  ;;  %2561 = vmatprep.mubr.msk.f32.mxu0 %vm2738_vm2, %v2737_v1 }
0x1310   :  { %2535 = vmatmul.mubr.msk.f32.vlgmr.msra.gmra.mxu1 %vm222_vm3, %v1618_v62  ;;  %2555 = vmatprep.subr.mxu0 %v2737_v1 }
0x1311   :  { %2546 = vmatpush3.bf16.msra.mxu1 %v3173_v13  ;;  %2549 = vmatprep.mubr.msk.bf16.mxu1 %vm2738_vm2, %v2737_v1 }
0x1312   :  { %2547 = vmatprep.subr.bf16.mxu1 %v2737_v1  ;;  %2556 = vmatpush3.msra.mxu0 %v2731_v44 }
0x1313   :  { %2557 = vmatprep.subr.mxu0 %v2737_v1  ;;  %v1766_v4 = vpop.permute.xlu0 %1765 }
0x1314   :  { %2558 = vmatpush3.msra.mxu0 %v2732_v0 }
0x1315   :  { %2548 = vmatpush3.bf16.msra.mxu1 %v3183_v16  ;;  %2559 = vmatprep.subr.mxu0 %v2737_v1 }
0x1316   :  { %2564 = vmatprep.subr.bf16.mxu1 %v2737_v1  ;;  %2560 = vmatpush3.msra.mxu0 %v2733_v2 }
0x1317   :  { %2572 = vmatprep.subr.mxu0 %v2737_v1 }
0x1318   :  { %2550 = vmatmul.mubr.msk.bf16.vlgmr.msra.gmra.mxu1 %vm222_vm3, %v1766_v4 }
0x1319   :  { %2565 = vmatpush3.bf16.msra.mxu1 %v2734_v45  ;;  %2568 = vmatprep.mubr.msk.bf16.mxu1 %vm2738_vm2, %v2737_v1 }
0x131a   :  { %2566 = vmatprep.subr.bf16.mxu1 %v2737_v1 }
0x131d   :  { %2567 = vmatpush3.bf16.msra.mxu1 %v2735_v6  ;;  %v1985_v6 = vld [vmem:[%s3337_s7 + $0x18] sm:$0xff] }
0x13ce   :  { %v1732_v9 = vpop.f32.mrf.mxu0 }
0x13d0   :  { %v1687_v10 = vpop.f32.mrf.mxu1  ;;  %v2543_v11 = vpop.f32.mrf.mxu0 }
0x13d1   :  { %v1688_v12 = vadd.f32 %v2968_v54, %v1687_v10  ;;  %v1983_v10 = vld [vmem:[%s3337_s7 + $0x8] sm:$0xff]  ;;  %v1982_v11 = vld [vmem:[%s3337_s7] sm:$0xff] }
0x13d2   :  { %v2536_v7 = vpop.f32.mrf.mxu1  ;;  %v1735_v13 = vpop.f32.mrf.mxu0 }
0x13d3   :  { %v1738_v15 = vadd.f32 %v1732_v9, %v1688_v12  ;;  %v1984_v9 = vld [vmem:[%s3337_s7 + $0x10] sm:$0xff] }
0x13d4   :  { %v2544_v16 = vpop.f32.mrf.mxu0 }
0x13d5   :  { %2703 = vtanh.f32 %v1738_v15  ;;  %v2225_v54 = vmul.f32 -1.442695, %v1738_v15  ;;  %v2070_v16 = vld [vmem:[%s3338_s9 + $0x8] sm:$0xff] }
0x13d8   :  { %v1804_v29 = vpop.f32.mrf.mxu1 }
0x13d9   :  { %v1810_v30 = vadd.f32 %v1804_v29, %v194_v14  ;;  %v2069_v14 = vld [vmem:[%s3338_s9] sm:$0xff] }
0x13da   :  { %v2551_v31 = vpop.f32.mrf.mxu1  ;;  %v2231_v29 = vld [vmem:[%s3339_s8] ss:$0 sm:$0xff] }
0x13db   :  { %2705 = vtanh.f32 %v1810_v30  ;;  %v2227_v18 = vmul.f32 -1.442695, %v1810_v30 }
0x13dc   :  { %v1807_v33 = vpop.f32.mrf.mxu1  ;;  %2707 = vpow2.f32 %v2225_v54 }
0x13dd   :  { %2709 = vpow2.f32 %v2227_v18 }
0x13de   :  { %v2552_v19 = vpop.f32.mrf.mxu1 }
0x13e2   :  { %v2704_v20 = vpop.eup %2703 }
0x13e3   :  { %1748 = vrot.lane.b32.xlu1 %v2704_v20, %s2740_s19  ;;  %v18_v20 = vstv %s3340_s12 }
0x13e4   :  { %19 = vst [vmem:[#allocation2] sm:$0x1] %v18_v20 }
0x13e8   :  { %v2706_v23 = vpop.eup %2705 }
0x13e9   :  { %1820 = vrot.lane.b32.xlu0 %v2706_v23, %s2740_s19  ;;  %v2708_v36 = vpop.eup %2707 }
0x13ea   :  { %v1742_v17 = vadd.f32 1.0, %v2708_v36  ;;  %v2710_v26 = vpop.eup %2709  ;;  %v2235_v36 = vld [vmem:[%s3342_s11] ss:$0 sm:$0xff] }
0x13eb   :  { %v1814_v48 = vadd.f32 1.0, %v2710_v26 }
0x13ec   :  { %2711 = vrcp.f32 %v1742_v17 }
0x13ed   :  { %2713 = vrcp.f32 %v1814_v48 }
0x13f9   :  { %v2712_v35 = vpop.eup %2711 }
0x13fa   :  { %v2714_v5 = vpop.eup %2713  ;;  %v1746_v22 = vmul.f32 %v2712_v35, %v3217_v51 }
0x13fb   :  { %v1818_v34 = vmul.f32 %v2714_v5, %v3221_v52 }
0x1455   :  { %v1749_v27 = vpop.permute.xlu1 %1748 }
0x1456   :  { %v1751_v3 = vmul.f32 %v2712_v35, %v1749_v27 }
0x1458   :  { %1753 = vrot.lane.b32.xlu1 %v1751_v3, %s2740_s19 }
0x145b   :  { %v1821_v21 = vpop.permute.xlu0 %1820 }
0x145c   :  { %v1823_v28 = vmul.f32 %v2714_v5, %v1821_v21 }
0x145e   :  { %1825 = vrot.lane.b32.xlu0 %v1823_v28, %s2740_s19 }
0x14ca   :  { %v1754_v32 = vpop.permute.xlu1 %1753 }
0x14cb   :  { %v1756_v49 = vadd.f32 %v1754_v32, %v1746_v22 }
0x14cd   :  { %2715 = vtanh.f32 %v1756_v49 }
0x14d0   :  { %v1826_v37 = vpop.permute.xlu0 %1825 }
0x14d1   :  { %v1828_v24 = vadd.f32 %v1826_v37, %v1818_v34 }
0x14d3   :  { %2717 = vtanh.f32 %v1828_v24 }
0x14da   :  { %v2716_v38 = vpop.eup %2715 }
0x14db   :  { %1759 = vrot.lane.b32.xlu1 %v2716_v38, %s2740_s19 }
0x14e0   :  { %v2718_v39 = vpop.eup %2717 }
0x14e1   :  { %1831 = vrot.lane.b32.xlu0 %v2718_v39, %s2740_s19 }
0x154d   :  { %v1760_v25 = vpop.permute.xlu1 %1759 }
0x154e   :  { %v1762_v40 = vmul.f32 %v2712_v35, %v1760_v25  ;;  %v2236_v35 = vld [vmem:[#allocation2] ss:$0 sm:$0xff] }
0x1550   :  { %v1910_v41 = vpack.c.bf16 %v1762_v40, %v1762_v40 }
0x1552   :  { %1912 = vrot.lane.b32.xlu0 %v1910_v41, %s2741_s0 }
0x1553   :  { %v1832_v42 = vpop.permute.xlu0 %1831 }
0x1554   :  { %v1834_v43 = vmul.f32 %v2714_v5, %v1832_v42 }
0x1556   :  { %1836 = vrot.lane.b32.xlu1 %v1834_v43, %s2741_s0 }
0x15c4   :  { %v1913_v50 = vpop.permute.xlu0 %1912 }
0x15c5   :  { %2569 = vmatmul.mubr.msk.bf16.vlgmr.msra.gmra.mxu1 %vm222_vm3, %v1913_v50 }
0x15c8   :  { %v1837_v51 = vpop.permute.xlu1 %1836 }
0x15c9   :  { %2562 = vmatmul.mubr.msk.f32.vlgmr.msra.gmra.mxu0 %vm222_vm3, %v1837_v51 }
0x15ca   :  { %2580 = vmatprep.mubr.msk.f32.mxu0 %vm2738_vm2, %v2737_v1  ;;  %2573 = vmatpush3.msra.mxu0 %v1985_v6 }
0x15cb   :  { %2574 = vmatprep.subr.mxu0 %v2737_v1 }
0x15cc   :  { %2575 = vmatpush3.msra.mxu0 %v1984_v9 }
0x15cd   :  { %2576 = vmatprep.subr.mxu0 %v2737_v1 }
0x15ce   :  { %2577 = vmatpush3.msra.mxu0 %v1983_v10 }
0x15cf   :  { %2578 = vmatprep.subr.mxu0 %v2737_v1 }
0x15d0   :  { %2579 = vmatpush3.msra.mxu0 %v1982_v11 }
0x15d1   :  { %2583 = vmatprep.subr.mxu0 %v2737_v1 }
0x1685   :  { %v1951_v8 = vpop.f32.mrf.mxu1 }
0x1687   :  { %v2570_v46 = vpop.f32.mrf.mxu1 }
0x1689   :  { %v1906_v52 = vpop.f32.mrf.mxu0  ;;  %v1954_v53 = vpop.f32.mrf.mxu1 }
0x168a   :  { %v1907_v56 = vadd.f32 %v2736_v55, %v1906_v52 }
0x168b   :  { %v2563_v57 = vpop.f32.mrf.mxu0  ;;  %v2571_v58 = vpop.f32.mrf.mxu1 }
0x168c   :  { %v1957_v59 = vadd.f32 %v1951_v8, %v1907_v56 }
0x168e   :  { %2719 = vtanh.f32 %v1957_v59  ;;  %v2230_v60 = vmul.f32 -1.442695, %v1957_v59 }
0x1690   :  { %2721 = vpow2.f32 %v2230_v60 }
0x169b   :  { %v2720_v47 = vpop.eup %2719 }
0x169c   :  { %1967 = vrot.lane.b32.xlu1 %v2720_v47, %s2740_s19 }
0x169d   :  { %v2722_v61 = vpop.eup %2721 }
0x169e   :  { %v1961_v62 = vadd.f32 1.0, %v2722_v61 }
0x16a0   :  { %2723 = vrcp.f32 %v1961_v62 }
0x16ad   :  { %v2724_v63 = vpop.eup %2723 }
0x16ae   :  { %v1965_v2 = vmul.f32 %v2724_v63, %v1756_v49 }
0x170e   :  { %v1968_v44 = vpop.permute.xlu1 %1967 }
0x170f   :  { %v1970_v0 = vmul.f32 %v2724_v63, %v1968_v44 }
0x1711   :  { %1972 = vrot.lane.b32.xlu0 %v1970_v0, %s2740_s19 }
0x1783   :  { %v1973_v4 = vpop.permute.xlu0 %1972 }
0x1784   :  { %v1975_v45 = vadd.f32 %v1973_v4, %v1965_v2 }
0x1786   :  { %2725 = vtanh.f32 %v1975_v45 }
0x1793   :  { %v2726_v12 = vpop.eup %2725 }
0x1794   :  { %1978 = vrot.lane.b32.xlu1 %v2726_v12, %s2740_s19 }
0x1806   :  { %v1979_v7 = vpop.permute.xlu1 %1978 }
0x1807   :  { %v1981_v13 = vmul.f32 %v2724_v63, %v1979_v7 }
0x1809   :  { %1994 = vrot.lane.b32.xlu0 %v1981_v13, %s2741_s0 }
0x187b   :  { %v1995_v15 = vpop.permute.xlu0 %1994 }
0x187c   :  { %2581 = vmatmul.mubr.msk.f32.vlgmr.msra.gmra.mxu0 %vm222_vm3, %v1995_v15 }
0x187d   :  { %2587 = vmatprep.mubr.msk.f32.mxu0 %vm2738_vm2, %v2737_v1  ;;  %2584 = vmatpush3.msra.mxu0 %v2070_v16 }
0x187e   :  { %2585 = vmatprep.subr.mxu0 %v2737_v1  ;;  %v2233_v1 = vld [vmem:[%s3341_s10] ss:$0 sm:$0xff] }
0x187f   :  { %2586 = vmatpush3.msra.mxu0 %v2069_v14 }
0x193c   :  { %v2064_v30 = vpop.f32.mrf.mxu0 }
0x193d   :  { %v2065_v31 = vadd.f32 %v2231_v29, %v2064_v30 }
0x193e   :  { %v2582_v33 = vpop.f32.mrf.mxu0 }
0x193f   :  { %v2068_v19 = vmax.f32 %v2065_v31, 0.0 }
0x1941   :  { %2588 = vmatmul.mubr.msk.f32.vlgmr.msra.gmra.mxu0 %vm2078_vm4, %v2068_v19 }
0x1a01   :  { %v2148_v23 = vpop.f32.mrf.mxu0 }
0x1a02   :  { %v2149_v54 = vadd.f32 %v2233_v1, %v2148_v23 }
0x1a03   :  { %v2589_v18 = vpop.f32.mrf.mxu0 }
0x1a04   :  { %v2152_v17 = vmax.f32 %v2149_v54, 0.0 }
0x1a06   :  { %v2160_v26 = vmul.f32 %v2235_v36, %v2152_v17 }
0x1a08   :  { %v2161_v48 = vsel %vm2078_vm4, %v2160_v26, 0.0 }
0x1a09   :  { %2162 = vadd.xlane.f32.xlu1 %v2161_v48 }
0x1a92   :  { %v2163_v27 = vpop.xlane.xlu1 %2162 }
0x1a93   :  { %v2171_v3 = vadd.f32 %v2236_v35, %v2163_v27 }
0x1a95   :  { %2173 = vst.msk [vmem:[%s3343_s13] sm:$0xff] %vm2172_vm5, %v2171_v3 }

</bundles_post_ra>
